<compile_context>
chip_gen: v7x
topology: tpu7x:2x2x1
jax: 0.10.0
libtpu: 0.0.40
codegen_flags: <defaults>
</compile_context>

<pallas_src>
import math

import numpy as np

import jax
import jax.numpy as jnp
from jax.experimental import pallas as pl
from jax.experimental.pallas import tpu as pltpu

# ---------------- model hyper-parameters (small but shape-consistent) -----------
INPUT_DIM = 41                   # energy(1) + atomic(4) + mfp(4) + engineered(32)
OUTPUT_DIM = 6
D_MODEL = 64
NUM_LAYERS = 2
DIM_FF = 128
ENERGY_DIM, ATOMIC_DIM, MFP_DIM = 1, 4, 4
ENGINEERED_DIM = INPUT_DIM - 1 - 4 - 4          # 32
ATOMIC_COLS = (1, 3, 5, 7)       # raw `src` columns, as in the PyTorch forward
MFP_COLS = (2, 4, 6, 8)
ENG_COL0 = 9

E_ENE = D_MODEL // 8             # energy embedding width
E_ATM = D_MODEL // 4             # atomic embedding width
E_MFP = D_MODEL // 4             # mfp embedding width
# TODO(synk): upstream FeatureEncoder uses d_model//2 for the engineered embedding,
# which makes the concatenation 9/8*d_model and would crash
# nn.MultiheadAttention(embed_dim=d_model); we use the remainder so the concat
# equals d_model, matching what the attention / fusion layers require.
E_ENG = D_MODEL - (E_ENE + E_ATM + E_MFP)
LN_EPS = 1e-5                    # PyTorch nn.LayerNorm default

BATCH = 32
TILE_B = 8                       # batch rows per grid step (>= 8 sublanes)

# ---------------- packed-parameter layout ----------------------------------------
# Bias / LayerNorm-affine / positional-encoding slab: one vector per 128-lane row,
# left-aligned, zero-padded.
SLAB_W = 128
assert DIM_FF <= SLAB_W and 2 * D_MODEL <= SLAB_W

ROW_B_EMB, ROW_G_EMB, ROW_BT_EMB = 0, 1, 2       # fused embedding bias / LN affine
ROW_B_FA = 3                                     # folded feature-attention bias
ROW_B_FUS, ROW_G_FUS, ROW_BT_FUS = 4, 5, 6       # feature_fusion
ROW_PE0 = 7                                      # positional encoding, position 0
ROW_L0 = 8
(LB_ATTN, LN1_G, LN1_B, LB_FF1, LB_FF2, LN2_G, LN2_B,
 LB_P1, LPN1_G, LPN1_B, LB_P2, LPN2_G, LPN2_B) = range(13)
ROWS_PER_LAYER = 13
ROW_H = ROW_L0 + ROWS_PER_LAYER * NUM_LAYERS
ROW_B_HEADS, ROW_B_O1, ROW_G_O, ROW_BT_O, ROW_B_O2 = (
    ROW_H, ROW_H + 1, ROW_H + 2, ROW_H + 3, ROW_H + 4)
N_BIAS_ROWS = ROW_H + 5

# 64x64 weight-stack indices
IDX_A_GROUP, IDX_W_FA, IDX_W_FUS, IDX_W_ATTN0 = 0, 1, 2, 3
N_W64 = 3 + NUM_LAYERS

_SQRT_2_OVER_PI = math.sqrt(2.0 / math.pi)


def _gelu(x):
    # tanh-approximate GELU (lowers to the EUP tanh slot).  PyTorch nn.GELU()
    # defaults to the exact erf form; deviation is ~1e-3 (accepted per review).
    return 0.5 * x * (1.0 + jnp.tanh(_SQRT_2_OVER_PI * (x + 0.044715 * x * x * x)))


# ---------------- the Pallas kernel -----------------------------------------------
def transformer_kernel(src_ref, bias_ref, w_emb_ref, w64_ref, w_up_ref, w_dn_ref,
                       w_o1_ref, w_heads_ref, w_o2_ref, out_ref):
    """One TILE_B-row slice of the full TransformerPredictor forward pass."""

    def bvec(row, n=D_MODEL):
        # one packed parameter vector (bias / gamma / beta / pe), shape [1, n]
        v = bias_ref[row:row + 1, :]
        return v[:, 0:n]

    def dot(a, b):
        return jnp.dot(a, b, preferred_element_type=jnp.float32)

    def layer_norm(x, row_g, row_b, n=D_MODEL):
        mu = jnp.mean(x, axis=-1, keepdims=True)
        var = jnp.mean(jnp.square(x - mu), axis=-1, keepdims=True)
        return (x - mu) * jax.lax.rsqrt(var + LN_EPS) * bvec(row_g, n) + bvec(row_b, n)

    src = src_ref[...]                                        # [TB, 41]

    # ---- FeatureEncoder: block-diagonal fused Linear -> GELU -> grouped LayerNorm
    y = _gelu(dot(src, w_emb_ref[...]) + bvec(ROW_B_EMB))     # [TB, 64]
    a_grp = w64_ref[IDX_A_GROUP]                              # group-averaging matrix
    mu = dot(y, a_grp)                                        # per-group mean (bcast)
    var = dot(jnp.square(y - mu), a_grp)                      # per-group variance
    y = (y - mu) * jax.lax.rsqrt(var + LN_EPS) * bvec(ROW_G_EMB) + bvec(ROW_BT_EMB)

    # ---- feature_attention (seq_len==1 -> host-folded Wv@Wout) + feature_fusion
    attn = dot(y, w64_ref[IDX_W_FA]) + bvec(ROW_B_FA)
    x = _gelu(dot(attn, w64_ref[IDX_W_FUS]) + bvec(ROW_B_FUS))
    x = layer_norm(x, ROW_G_FUS, ROW_BT_FUS)

    # ---- PositionalEncoding (sequence position 0)
    x = x + bvec(ROW_PE0)

    # ---- TransformerEncoderWithPhysics layers (weights loaded lazily per layer)
    for l in range(NUM_LAYERS):
        r = ROW_L0 + l * ROWS_PER_LAYER
        # self-attention (seq_len==1, host-folded) + residual + norm1
        src2 = dot(x, w64_ref[IDX_W_ATTN0 + l]) + bvec(r + LB_ATTN)
        x = layer_norm(x + src2, r + LN1_G, r + LN1_B)
        # feed-forward + residual + norm2
        h = _gelu(dot(x, w_up_ref[l]) + bvec(r + LB_FF1, DIM_FF))
        x = layer_norm(x + dot(h, w_dn_ref[l]) + bvec(r + LB_FF2),
                       r + LN2_G, r + LN2_B)
        # PhysicsConstraintLayer: constraint_net(x) + x
        h = _gelu(dot(x, w_up_ref[NUM_LAYERS + l]) + bvec(r + LB_P1, 2 * D_MODEL))
        h = layer_norm(h, r + LPN1_G, r + LPN1_B, 2 * D_MODEL)
        h = _gelu(dot(h, w_dn_ref[NUM_LAYERS + l]) + bvec(r + LB_P2))
        h = layer_norm(h, r + LPN2_G, r + LPN2_B)
        x = x + h

    # ---- output heads (no_scatter / scatter attention fused into one [64,6] linear)
    logits = dot(x, w_heads_ref[...]) + bvec(ROW_B_HEADS, OUTPUT_DIM)      # [TB, 6]
    # shared per-row max: same constant for both 3-wide groups -> softmax unchanged
    e = jnp.exp(logits - jnp.max(logits, axis=-1, keepdims=True))
    ns_attn = e[:, 0:3] / jnp.sum(e[:, 0:3], axis=-1, keepdims=True)
    sc_attn = e[:, 3:6] / jnp.sum(e[:, 3:6], axis=-1, keepdims=True)

    h = _gelu(dot(x, w_o1_ref[...]) + bvec(ROW_B_O1, D_MODEL // 2))
    h = layer_norm(h, ROW_G_O, ROW_BT_O, D_MODEL // 2)
    out = dot(h, w_o2_ref[...]) + bvec(ROW_B_O2, OUTPUT_DIM)               # [TB, 6]

    out_ref[:, 0:3] = out[:, 0:3] * ns_attn
    out_ref[:, 3:6] = out[:, 3:6] * sc_attn


# ---------------- parameter construction (deterministic, synthetic) --------------
def _xavier(key, shape):
    fan_in, fan_out = shape[-2], shape[-1]
    lim = math.sqrt(6.0 / (fan_in + fan_out))
    return jax.random.uniform(key, shape, jnp.float32, -lim, lim)


def init_params(key):
    """Synthetic parameters in the original (unfolded, per-module) layout.

    All linear weights are pre-transposed to [in_features, out_features] so a
    layer is y = x @ W + b.  (With real PyTorch weights, W here is weight.T and
    the attention value projection Wv is in_proj_weight[2D:3D, :].T.)
    """
    ks = iter(jax.random.split(key, 64))
    nk = lambda: next(ks)
    small = lambda shape: 0.02 * jax.random.normal(nk(), shape, jnp.float32)
    ones = lambda shape: jnp.ones(shape, jnp.float32)
    zeros = lambda shape: jnp.zeros(shape, jnp.float32)

    raw = {}
    # FeatureEncoder per-group embeddings: Linear + LayerNorm (Dropout = identity)
    for name, din, dout in (("ene", ENERGY_DIM, E_ENE), ("atm", ATOMIC_DIM, E_ATM),
                            ("mfp", MFP_DIM, E_MFP), ("eng", ENGINEERED_DIM, E_ENG)):
        raw[f"w_{name}"] = _xavier(nk(), (din, dout))
        raw[f"b_{name}"] = small((dout,))
        raw[f"g_{name}"] = ones((dout,))
        raw[f"bt_{name}"] = zeros((dout,))

    # feature_attention: only V / out_proj are numerically live at seq_len == 1
    raw["wv_fa"], raw["bv_fa"] = _xavier(nk(), (D_MODEL, D_MODEL)), small((D_MODEL,))
    raw["wo_fa"], raw["bo_fa"] = _xavier(nk(), (D_MODEL, D_MODEL)), small((D_MODEL,))
    # feature_fusion
    raw["w_fus"], raw["b_fus"] = _xavier(nk(), (D_MODEL, D_MODEL)), small((D_MODEL,))
    raw["g_fus"], raw["bt_fus"] = ones((D_MODEL,)), zeros((D_MODEL,))
    # positional encoding, position 0: sin(0)=0 (even lanes), cos(0)=1 (odd lanes)
    raw["pe0"] = jnp.zeros((D_MODEL,), jnp.float32).at[1::2].set(1.0)

    # encoder layers, stacked on a leading NUM_LAYERS axis
    xs = lambda shape: jnp.stack([_xavier(nk(), shape) for _ in range(NUM_LAYERS)])
    ss = lambda shape: 0.02 * jax.random.normal(nk(), (NUM_LAYERS,) + shape, jnp.float32)
    raw["wv_l"], raw["bv_l"] = xs((D_MODEL, D_MODEL)), ss((D_MODEL,))
    raw["wo_l"], raw["bo_l"] = xs((D_MODEL, D_MODEL)), ss((D_MODEL,))
    raw["n1_g"], raw["n1_b"] = ones((NUM_LAYERS, D_MODEL)), zeros((NUM_LAYERS, D_MODEL))
    raw["w1"], raw["b1"] = xs((D_MODEL, DIM_FF)), ss((DIM_FF,))
    raw["w2"], raw["b2"] = xs((DIM_FF, D_MODEL)), ss((D_MODEL,))
    raw["n2_g"], raw["n2_b"] = ones((NUM_LAYERS, D_MODEL)), zeros((NUM_LAYERS, D_MODEL))
    raw["p1"], raw["pb1"] = xs((D_MODEL, 2 * D_MODEL)), ss((2 * D_MODEL,))
    raw["pn1_g"], raw["pn1_b"] = (ones((NUM_LAYERS, 2 * D_MODEL)),
                                  zeros((NUM_LAYERS, 2 * D_MODEL)))
    raw["p2"], raw["pb2"] = xs((2 * D_MODEL, D_MODEL)), ss((D_MODEL,))
    raw["pn2_g"], raw["pn2_b"] = ones((NUM_LAYERS, D_MODEL)), zeros((NUM_LAYERS, D_MODEL))

    # output heads
    raw["w_ns"], raw["b_ns"] = _xavier(nk(), (D_MODEL, 3)), small((3,))
    raw["w_sc"], raw["b_sc"] = _xavier(nk(), (D_MODEL, 3)), small((3,))
    raw["w_o1"], raw["b_o1"] = _xavier(nk(), (D_MODEL, D_MODEL // 2)), small((D_MODEL // 2,))
    raw["g_o"], raw["bt_o"] = ones((D_MODEL // 2,)), zeros((D_MODEL // 2,))
    raw["w_o2"], raw["b_o2"] = _xavier(nk(), (D_MODEL // 2, OUTPUT_DIM)), small((OUTPUT_DIM,))
    return raw


def pack_params(raw):
    """Host-side folding + packing of the raw parameters into 8 kernel inputs."""
    f32 = np.float32

    # fused block-diagonal embedding weight, rows permuted to raw `src` column order
    w_emb = np.zeros((INPUT_DIM, D_MODEL), f32)
    o1, o2, o3 = E_ENE, E_ENE + E_ATM, E_ENE + E_ATM + E_MFP
    w_emb[0, :o1] = np.asarray(raw["w_ene"])[0]
    for k, c in enumerate(ATOMIC_COLS):
        w_emb[c, o1:o2] = np.asarray(raw["w_atm"])[k]
    for k, c in enumerate(MFP_COLS):
        w_emb[c, o2:o3] = np.asarray(raw["w_mfp"])[k]
    w_emb[ENG_COL0:, o3:] = np.asarray(raw["w_eng"])

    # grouped-LayerNorm averaging matrix: A[i, j] = 1/width(g) if i, j in group g
    a_group = np.zeros((D_MODEL, D_MODEL), f32)
    off = 0
    for w in (E_ENE, E_ATM, E_MFP, E_ENG):
        a_group[off:off + w, off:off + w] = 1.0 / w
        off += w

    # seq_len == 1 attention fold: W = Wv @ Wout, b = bv @ Wout + bout
    def fold(wv, bv, wo, bo):
        return np.asarray(wv @ wo, f32), np.asarray(bv @ wo + bo, f32)

    w_fa, b_fa = fold(raw["wv_fa"], raw["bv_fa"], raw["wo_fa"], raw["bo_fa"])
    folded = [fold(raw["wv_l"][l], raw["bv_l"][l], raw["wo_l"][l], raw["bo_l"][l])
              for l in range(NUM_LAYERS)]

    w64 = np.stack([a_group, w_fa, np.asarray(raw["w_fus"], f32)]
                   + [w for w, _ in folded])                        # [3+L, 64, 64]
    w_up = np.concatenate([np.asarray(raw["w1"], f32),
                           np.asarray(raw["p1"], f32)], axis=0)     # [2L, 64, 128]
    w_dn = np.concatenate([np.asarray(raw["w2"], f32),
                           np.asarray(raw["p2"], f32)], axis=0)     # [2L, 128, 64]
    w_heads = np.concatenate([np.asarray(raw["w_ns"], f32),
                              np.asarray(raw["w_sc"], f32)], axis=1)  # [64, 6]

    # bias / LN / pe slab: one left-aligned vector per 128-lane row
    slab = np.zeros((N_BIAS_ROWS, SLAB_W), f32)

    def put(row, vec):
        v = np.asarray(vec, f32).reshape(-1)
        slab[row, :v.shape[0]] = v

    put(ROW_B_EMB, np.concatenate([np.asarray(raw["b_ene"]), np.asarray(raw["b_atm"]),
                                   np.asarray(raw["b_mfp"]), np.asarray(raw["b_eng"])]))
    put(ROW_G_EMB, np.concatenate([np.asarray(raw["g_ene"]), np.asarray(raw["g_atm"]),
                                   np.asarray(raw["g_mfp"]), np.asarray(raw["g_eng"])]))
    put(ROW_BT_EMB, np.concatenate([np.asarray(raw["bt_ene"]), np.asarray(raw["bt_atm"]),
                                    np.asarray(raw["bt_mfp"]), np.asarray(raw["bt_eng"])]))
    put(ROW_B_FA, b_fa)
    put(ROW_B_FUS, raw["b_fus"]); put(ROW_G_FUS, raw["g_fus"]); put(ROW_BT_FUS, raw["bt_fus"])
    put(ROW_PE0, raw["pe0"])
    for l in range(NUM_LAYERS):
        r = ROW_L0 + l * ROWS_PER_LAYER
        put(r + LB_ATTN, folded[l][1])
        put(r + LN1_G, raw["n1_g"][l]); put(r + LN1_B, raw["n1_b"][l])
        put(r + LB_FF1, raw["b1"][l]);  put(r + LB_FF2, raw["b2"][l])
        put(r + LN2_G, raw["n2_g"][l]); put(r + LN2_B, raw["n2_b"][l])
        put(r + LB_P1, raw["pb1"][l])
        put(r + LPN1_G, raw["pn1_g"][l]); put(r + LPN1_B, raw["pn1_b"][l])
        put(r + LB_P2, raw["pb2"][l])
        put(r + LPN2_G, raw["pn2_g"][l]); put(r + LPN2_B, raw["pn2_b"][l])
    put(ROW_B_HEADS, np.concatenate([np.asarray(raw["b_ns"]), np.asarray(raw["b_sc"])]))
    put(ROW_B_O1, raw["b_o1"]); put(ROW_G_O, raw["g_o"]); put(ROW_BT_O, raw["bt_o"])
    put(ROW_B_O2, raw["b_o2"])

    return dict(bias=jnp.asarray(slab), w_emb=jnp.asarray(w_emb), w64=jnp.asarray(w64),
                w_up=jnp.asarray(w_up), w_dn=jnp.asarray(w_dn),
                w_o1=jnp.asarray(raw["w_o1"], jnp.float32),
                w_heads=jnp.asarray(w_heads),
                w_o2=jnp.asarray(raw["w_o2"], jnp.float32))


# ---------------- wrapper ----------------------------------------------------------
def transformer_predictor(src, packed):
    """Runs the fused kernel with a 1-D parallel grid over batch tiles."""
    b = src.shape[0]
    assert b % TILE_B == 0, "batch must be a multiple of TILE_B"

    bias, w_emb, w64 = packed["bias"], packed["w_emb"], packed["w64"]
    w_up, w_dn = packed["w_up"], packed["w_dn"]
    w_o1, w_heads, w_o2 = packed["w_o1"], packed["w_heads"], packed["w_o2"]

    def resident(arr):
        nd = arr.ndim
        return pl.BlockSpec(arr.shape, lambda *_: (0,) * nd)   # stays in VMEM; no re-DMA

    grid_spec = pltpu.PrefetchScalarGridSpec(
        num_scalar_prefetch=0,
        grid=(b // TILE_B,),
        in_specs=[
            pl.BlockSpec((TILE_B, INPUT_DIM), lambda i: (i, 0)),   # per-tile activations
            resident(bias), resident(w_emb), resident(w64),
            resident(w_up), resident(w_dn),
            resident(w_o1), resident(w_heads), resident(w_o2),
        ],
        out_specs=pl.BlockSpec((TILE_B, OUTPUT_DIM), lambda i: (i, 0)),
    )
    return pl.pallas_call(
        transformer_kernel,
        out_shape=jax.ShapeDtypeStruct((b, OUTPUT_DIM), jnp.float32),
        grid_spec=grid_spec,
        compiler_params=pltpu.CompilerParams(dimension_semantics=("parallel",)),
    )(src, bias, w_emb, w64, w_up, w_dn, w_o1, w_heads, w_o2)


# ---------------- pure-JAX reference (unfolded params) ------------------------------
def reference_forward(src, raw):
    def ln(x, gamma, beta):
        mu = jnp.mean(x, axis=-1, keepdims=True)
        var = jnp.mean(jnp.square(x - mu), axis=-1, keepdims=True)
        return (x - mu) * jax.lax.rsqrt(var + LN_EPS) * gamma + beta

    energy = src[:, 0:1]
    atomic = src[:, jnp.array(ATOMIC_COLS)]
    mfp = src[:, jnp.array(MFP_COLS)]
    eng = src[:, ENG_COL0:]

    def embed(v, n):
        return ln(_gelu(v @ raw[f"w_{n}"] + raw[f"b_{n}"]), raw[f"g_{n}"], raw[f"bt_{n}"])

    x = jnp.concatenate([embed(energy, "ene"), embed(atomic, "atm"),
                         embed(mfp, "mfp"), embed(eng, "eng")], axis=1)

    # seq_len == 1: attention output == out_proj(value_proj(x))
    attn = (x @ raw["wv_fa"] + raw["bv_fa"]) @ raw["wo_fa"] + raw["bo_fa"]
    x = ln(_gelu(attn @ raw["w_fus"] + raw["b_fus"]), raw["g_fus"], raw["bt_fus"])
    x = x + raw["pe0"]

    for l in range(NUM_LAYERS):
        src2 = (x @ raw["wv_l"][l] + raw["bv_l"][l]) @ raw["wo_l"][l] + raw["bo_l"][l]
        x = ln(x + src2, raw["n1_g"][l], raw["n1_b"][l])
        ff = _gelu(x @ raw["w1"][l] + raw["b1"][l]) @ raw["w2"][l] + raw["b2"][l]
        x = ln(x + ff, raw["n2_g"][l], raw["n2_b"][l])
        h = ln(_gelu(x @ raw["p1"][l] + raw["pb1"][l]), raw["pn1_g"][l], raw["pn1_b"][l])
        h = ln(_gelu(h @ raw["p2"][l] + raw["pb2"][l]), raw["pn2_g"][l], raw["pn2_b"][l])
        x = x + h

    ns = jax.nn.softmax(x @ raw["w_ns"] + raw["b_ns"], axis=-1)
    sc = jax.nn.softmax(x @ raw["w_sc"] + raw["b_sc"], axis=-1)
    h = ln(_gelu(x @ raw["w_o1"] + raw["b_o1"]), raw["g_o"], raw["bt_o"])
    out = h @ raw["w_o2"] + raw["b_o2"]
    return jnp.concatenate([out[:, :3] * ns, out[:, 3:] * sc], axis=1)


if __name__ == "__main__":
    key = jax.random.PRNGKey(0)
    k_src, k_par = jax.random.split(key)
    src = jax.random.normal(k_src, (BATCH, INPUT_DIM), jnp.float32)

    raw = init_params(k_par)
    packed = pack_params(raw)

    out = jax.block_until_ready(transformer_predictor(src, packed))
    assert out.shape == (BATCH, OUTPUT_DIM), out.shape
    assert bool(jnp.all(jnp.isfinite(out)))

    # Sanity check against an unfolded pure-JAX reference.  Tolerance is loose
    # because kernel and XLA may use different MXU f32 accumulation strategies;
    # structural/packing errors would be orders of magnitude larger.
    ref = jax.block_until_ready(reference_forward(src, raw))
    max_err = float(jnp.max(jnp.abs(out - ref)))
    assert max_err < 1e-1, f"kernel/reference mismatch: max |err| = {max_err}"
    print("KERNEL_OK")
</pallas_src>

<mosaic_0001>
module attributes {stable_mosaic.version = 11 : i64} {
  func.func @transformer_kernel(%arg0: i32, %arg1: memref<8x41xf32, #tpu.memory_space<vmem>>, %arg2: memref<39x128xf32, #tpu.memory_space<vmem>>, %arg3: memref<41x64xf32, #tpu.memory_space<vmem>>, %arg4: memref<5x64x64xf32, #tpu.memory_space<vmem>>, %arg5: memref<4x64x128xf32, #tpu.memory_space<vmem>>, %arg6: memref<4x128x64xf32, #tpu.memory_space<vmem>>, %arg7: memref<64x32xf32, #tpu.memory_space<vmem>>, %arg8: memref<64x6xf32, #tpu.memory_space<vmem>>, %arg9: memref<32x6xf32, #tpu.memory_space<vmem>>, %arg10: memref<8x6xf32, #tpu.memory_space<vmem>>) attributes {dimension_semantics = [#tpu.dimension_semantics<parallel>], iteration_bounds = array<i64: 4>, scalar_prefetch = 0 : i64, scratch_operands = 0 : i64, tpu.core_type = #tpu.core_type<tc>, window_params = [{transform_indices = @transform_0, window_bounds = array<i64: 8, 41>}, {pipeline_mode = #tpu.pipeline_mode<synchronous>, transform_indices = @transform_1, window_bounds = array<i64: 39, 128>}, {pipeline_mode = #tpu.pipeline_mode<synchronous>, transform_indices = @transform_2, window_bounds = array<i64: 41, 64>}, {pipeline_mode = #tpu.pipeline_mode<synchronous>, transform_indices = @transform_3, window_bounds = array<i64: 5, 64, 64>}, {pipeline_mode = #tpu.pipeline_mode<synchronous>, transform_indices = @transform_4, window_bounds = array<i64: 4, 64, 128>}, {pipeline_mode = #tpu.pipeline_mode<synchronous>, transform_indices = @transform_5, window_bounds = array<i64: 4, 128, 64>}, {pipeline_mode = #tpu.pipeline_mode<synchronous>, transform_indices = @transform_6, window_bounds = array<i64: 64, 32>}, {pipeline_mode = #tpu.pipeline_mode<synchronous>, transform_indices = @transform_7, window_bounds = array<i64: 64, 6>}, {pipeline_mode = #tpu.pipeline_mode<synchronous>, transform_indices = @transform_8, window_bounds = array<i64: 32, 6>}, {transform_indices = @transform_9, window_bounds = array<i64: 8, 6>}]} {
    %c0 = arith.constant 0 : index
    %c0_0 = arith.constant 0 : index
    %0 = vector.load %arg1[%c0, %c0_0] : memref<8x41xf32, #tpu.memory_space<vmem>>, vector<8x41xf32>
    %c0_1 = arith.constant 0 : index
    %c0_2 = arith.constant 0 : index
    %1 = vector.load %arg3[%c0_1, %c0_2] : memref<41x64xf32, #tpu.memory_space<vmem>>, vector<41x64xf32>
    %cst = arith.constant dense<0.000000e+00> : vector<8x64xf32>
    %2 = tpu.matmul %0, %1, %cst {dimension_numbers = #tpu.dot_dimension_numbers<[1], [0], [0], [1], [0, 0, 1, 1], [], []>} : vector<8x41xf32>, vector<41x64xf32>, vector<8x64xf32> -> vector<8x64xf32>
    %c0_3 = arith.constant 0 : index
    %c0_4 = arith.constant 0 : index
    %3 = vector.load %arg2[%c0_3, %c0_4] : memref<39x128xf32, #tpu.memory_space<vmem>>, vector<1x128xf32>
    %4 = vector.extract_strided_slice %3 {offsets = [0, 0], sizes = [1, 64], strides = [1, 1]} : vector<1x128xf32> to vector<1x64xf32>
    %5 = vector.broadcast %4 : vector<1x64xf32> to vector<8x64xf32>
    %6 = arith.addf %2, %5 : vector<8x64xf32>
    %cst_5 = arith.constant 5.000000e-01 : f32
    %7 = vector.broadcast %cst_5 : f32 to vector<8x64xf32>
    %8 = arith.mulf %7, %6 : vector<8x64xf32>
    %cst_6 = arith.constant 4.471500e-02 : f32
    %9 = vector.broadcast %cst_6 : f32 to vector<8x64xf32>
    %10 = arith.mulf %9, %6 : vector<8x64xf32>
    %11 = arith.mulf %10, %6 : vector<8x64xf32>
    %12 = arith.mulf %11, %6 : vector<8x64xf32>
    %13 = arith.addf %6, %12 : vector<8x64xf32>
    %cst_7 = arith.constant 0.797884583 : f32
    %14 = vector.broadcast %cst_7 : f32 to vector<8x64xf32>
    %15 = arith.mulf %14, %13 : vector<8x64xf32>
    %16 = math.tanh %15 : vector<8x64xf32>
    %cst_8 = arith.constant 1.000000e+00 : f32
    %17 = vector.broadcast %cst_8 : f32 to vector<8x64xf32>
    %18 = arith.addf %17, %16 : vector<8x64xf32>
    %19 = arith.mulf %8, %18 : vector<8x64xf32>
    %c0_9 = arith.constant 0 : index
    %c0_10 = arith.constant 0 : index
    %c0_11 = arith.constant 0 : index
    %20 = vector.load %arg4[%c0_9, %c0_10, %c0_11] : memref<5x64x64xf32, #tpu.memory_space<vmem>>, vector<1x64x64xf32>
    %21 = vector.shape_cast %20 : vector<1x64x64xf32> to vector<64x64xf32>
    %cst_12 = arith.constant dense<0.000000e+00> : vector<8x64xf32>
    %22 = tpu.matmul %19, %21, %cst_12 {dimension_numbers = #tpu.dot_dimension_numbers<[1], [0], [0], [1], [0, 0, 1, 1], [], []>} : vector<8x64xf32>, vector<64x64xf32>, vector<8x64xf32> -> vector<8x64xf32>
    %23 = arith.subf %19, %22 : vector<8x64xf32>
    %24 = arith.mulf %23, %23 : vector<8x64xf32>
    %cst_13 = arith.constant dense<0.000000e+00> : vector<8x64xf32>
    %25 = tpu.matmul %24, %21, %cst_13 {dimension_numbers = #tpu.dot_dimension_numbers<[1], [0], [0], [1], [0, 0, 1, 1], [], []>} : vector<8x64xf32>, vector<64x64xf32>, vector<8x64xf32> -> vector<8x64xf32>
    %26 = arith.subf %19, %22 : vector<8x64xf32>
    %cst_14 = arith.constant 9.99999974E-6 : f32
    %27 = vector.broadcast %cst_14 : f32 to vector<8x64xf32>
    %28 = arith.addf %25, %27 : vector<8x64xf32>
    %29 = math.rsqrt %28 : vector<8x64xf32>
    %30 = arith.mulf %26, %29 : vector<8x64xf32>
    %c1 = arith.constant 1 : index
    %c0_15 = arith.constant 0 : index
    %31 = vector.load %arg2[%c1, %c0_15] : memref<39x128xf32, #tpu.memory_space<vmem>>, vector<1x128xf32>
    %32 = vector.extract_strided_slice %31 {offsets = [0, 0], sizes = [1, 64], strides = [1, 1]} : vector<1x128xf32> to vector<1x64xf32>
    %33 = vector.broadcast %32 : vector<1x64xf32> to vector<8x64xf32>
    %34 = arith.mulf %30, %33 : vector<8x64xf32>
    %c2 = arith.constant 2 : index
    %c0_16 = arith.constant 0 : index
    %35 = vector.load %arg2[%c2, %c0_16] : memref<39x128xf32, #tpu.memory_space<vmem>>, vector<1x128xf32>
    %36 = vector.extract_strided_slice %35 {offsets = [0, 0], sizes = [1, 64], strides = [1, 1]} : vector<1x128xf32> to vector<1x64xf32>
    %37 = vector.broadcast %36 : vector<1x64xf32> to vector<8x64xf32>
    %38 = arith.addf %34, %37 : vector<8x64xf32>
    %c1_17 = arith.constant 1 : index
    %c0_18 = arith.constant 0 : index
    %c0_19 = arith.constant 0 : index
    %39 = vector.load %arg4[%c1_17, %c0_18, %c0_19] : memref<5x64x64xf32, #tpu.memory_space<vmem>>, vector<1x64x64xf32>
    %40 = vector.shape_cast %39 : vector<1x64x64xf32> to vector<64x64xf32>
    %cst_20 = arith.constant dense<0.000000e+00> : vector<8x64xf32>
    %41 = tpu.matmul %38, %40, %cst_20 {dimension_numbers = #tpu.dot_dimension_numbers<[1], [0], [0], [1], [0, 0, 1, 1], [], []>} : vector<8x64xf32>, vector<64x64xf32>, vector<8x64xf32> -> vector<8x64xf32>
    %c3 = arith.constant 3 : index
    %c0_21 = arith.constant 0 : index
    %42 = vector.load %arg2[%c3, %c0_21] : memref<39x128xf32, #tpu.memory_space<vmem>>, vector<1x128xf32>
    %43 = vector.extract_strided_slice %42 {offsets = [0, 0], sizes = [1, 64], strides = [1, 1]} : vector<1x128xf32> to vector<1x64xf32>
    %44 = vector.broadcast %43 : vector<1x64xf32> to vector<8x64xf32>
    %45 = arith.addf %41, %44 : vector<8x64xf32>
    %c2_22 = arith.constant 2 : index
    %c0_23 = arith.constant 0 : index
    %c0_24 = arith.constant 0 : index
    %46 = vector.load %arg4[%c2_22, %c0_23, %c0_24] : memref<5x64x64xf32, #tpu.memory_space<vmem>>, vector<1x64x64xf32>
    %47 = vector.shape_cast %46 : vector<1x64x64xf32> to vector<64x64xf32>
    %cst_25 = arith.constant dense<0.000000e+00> : vector<8x64xf32>
    %48 = tpu.matmul %45, %47, %cst_25 {dimension_numbers = #tpu.dot_dimension_numbers<[1], [0], [0], [1], [0, 0, 1, 1], [], []>} : vector<8x64xf32>, vector<64x64xf32>, vector<8x64xf32> -> vector<8x64xf32>
    %c4 = arith.constant 4 : index
    %c0_26 = arith.constant 0 : index
    %49 = vector.load %arg2[%c4, %c0_26] : memref<39x128xf32, #tpu.memory_space<vmem>>, vector<1x128xf32>
    %50 = vector.extract_strided_slice %49 {offsets = [0, 0], sizes = [1, 64], strides = [1, 1]} : vector<1x128xf32> to vector<1x64xf32>
    %51 = vector.broadcast %50 : vector<1x64xf32> to vector<8x64xf32>
    %52 = arith.addf %48, %51 : vector<8x64xf32>
    %cst_27 = arith.constant 5.000000e-01 : f32
    %53 = vector.broadcast %cst_27 : f32 to vector<8x64xf32>
    %54 = arith.mulf %53, %52 : vector<8x64xf32>
    %cst_28 = arith.constant 4.471500e-02 : f32
    %55 = vector.broadcast %cst_28 : f32 to vector<8x64xf32>
    %56 = arith.mulf %55, %52 : vector<8x64xf32>
    %57 = arith.mulf %56, %52 : vector<8x64xf32>
    %58 = arith.mulf %57, %52 : vector<8x64xf32>
    %59 = arith.addf %52, %58 : vector<8x64xf32>
    %cst_29 = arith.constant 0.797884583 : f32
    %60 = vector.broadcast %cst_29 : f32 to vector<8x64xf32>
    %61 = arith.mulf %60, %59 : vector<8x64xf32>
    %62 = math.tanh %61 : vector<8x64xf32>
    %cst_30 = arith.constant 1.000000e+00 : f32
    %63 = vector.broadcast %cst_30 : f32 to vector<8x64xf32>
    %64 = arith.addf %63, %62 : vector<8x64xf32>
    %65 = arith.mulf %54, %64 : vector<8x64xf32>
    %cst_31 = arith.constant dense<0.000000e+00> : vector<8xf32>
    %66 = vector.multi_reduction <add>, %65, %cst_31 [1] : vector<8x64xf32> to vector<8xf32>
    %67 = vector.shape_cast %66 : vector<8xf32> to vector<8x1xf32>
    %cst_32 = arith.constant 6.400000e+01 : f32
    %68 = vector.broadcast %cst_32 : f32 to vector<8x1xf32>
    %69 = arith.divf %67, %68 : vector<8x1xf32>
    %70 = vector.broadcast %69 : vector<8x1xf32> to vector<8x64xf32>
    %71 = arith.subf %65, %70 : vector<8x64xf32>
    %72 = arith.mulf %71, %71 : vector<8x64xf32>
    %cst_33 = arith.constant dense<0.000000e+00> : vector<8xf32>
    %73 = vector.multi_reduction <add>, %72, %cst_33 [1] : vector<8x64xf32> to vector<8xf32>
    %74 = vector.shape_cast %73 : vector<8xf32> to vector<8x1xf32>
    %cst_34 = arith.constant 6.400000e+01 : f32
    %75 = vector.broadcast %cst_34 : f32 to vector<8x1xf32>
    %76 = arith.divf %74, %75 : vector<8x1xf32>
    %77 = vector.broadcast %69 : vector<8x1xf32> to vector<8x64xf32>
    %78 = arith.subf %65, %77 : vector<8x64xf32>
    %cst_35 = arith.constant 9.99999974E-6 : f32
    %79 = vector.broadcast %cst_35 : f32 to vector<8x1xf32>
    %80 = arith.addf %76, %79 : vector<8x1xf32>
    %81 = math.rsqrt %80 : vector<8x1xf32>
    %82 = vector.broadcast %81 : vector<8x1xf32> to vector<8x64xf32>
    %83 = arith.mulf %78, %82 : vector<8x64xf32>
    %c5 = arith.constant 5 : index
    %c0_36 = arith.constant 0 : index
    %84 = vector.load %arg2[%c5, %c0_36] : memref<39x128xf32, #tpu.memory_space<vmem>>, vector<1x128xf32>
    %85 = vector.extract_strided_slice %84 {offsets = [0, 0], sizes = [1, 64], strides = [1, 1]} : vector<1x128xf32> to vector<1x64xf32>
    %86 = vector.broadcast %85 : vector<1x64xf32> to vector<8x64xf32>
    %87 = arith.mulf %83, %86 : vector<8x64xf32>
    %c6 = arith.constant 6 : index
    %c0_37 = arith.constant 0 : index
    %88 = vector.load %arg2[%c6, %c0_37] : memref<39x128xf32, #tpu.memory_space<vmem>>, vector<1x128xf32>
    %89 = vector.extract_strided_slice %88 {offsets = [0, 0], sizes = [1, 64], strides = [1, 1]} : vector<1x128xf32> to vector<1x64xf32>
    %90 = vector.broadcast %89 : vector<1x64xf32> to vector<8x64xf32>
    %91 = arith.addf %87, %90 : vector<8x64xf32>
    %c7 = arith.constant 7 : index
    %c0_38 = arith.constant 0 : index
    %92 = vector.load %arg2[%c7, %c0_38] : memref<39x128xf32, #tpu.memory_space<vmem>>, vector<1x128xf32>
    %93 = vector.extract_strided_slice %92 {offsets = [0, 0], sizes = [1, 64], strides = [1, 1]} : vector<1x128xf32> to vector<1x64xf32>
    %94 = vector.broadcast %93 : vector<1x64xf32> to vector<8x64xf32>
    %95 = arith.addf %91, %94 : vector<8x64xf32>
    %c3_39 = arith.constant 3 : index
    %c0_40 = arith.constant 0 : index
    %c0_41 = arith.constant 0 : index
    %96 = vector.load %arg4[%c3_39, %c0_40, %c0_41] : memref<5x64x64xf32, #tpu.memory_space<vmem>>, vector<1x64x64xf32>
    %97 = vector.shape_cast %96 : vector<1x64x64xf32> to vector<64x64xf32>
    %cst_42 = arith.constant dense<0.000000e+00> : vector<8x64xf32>
    %98 = tpu.matmul %95, %97, %cst_42 {dimension_numbers = #tpu.dot_dimension_numbers<[1], [0], [0], [1], [0, 0, 1, 1], [], []>} : vector<8x64xf32>, vector<64x64xf32>, vector<8x64xf32> -> vector<8x64xf32>
    %c8 = arith.constant 8 : index
    %c0_43 = arith.constant 0 : index
    %99 = vector.load %arg2[%c8, %c0_43] : memref<39x128xf32, #tpu.memory_space<vmem>>, vector<1x128xf32>
    %100 = vector.extract_strided_slice %99 {offsets = [0, 0], sizes = [1, 64], strides = [1, 1]} : vector<1x128xf32> to vector<1x64xf32>
    %101 = vector.broadcast %100 : vector<1x64xf32> to vector<8x64xf32>
    %102 = arith.addf %98, %101 : vector<8x64xf32>
    %103 = arith.addf %95, %102 : vector<8x64xf32>
    %cst_44 = arith.constant dense<0.000000e+00> : vector<8xf32>
    %104 = vector.multi_reduction <add>, %103, %cst_44 [1] : vector<8x64xf32> to vector<8xf32>
    %105 = vector.shape_cast %104 : vector<8xf32> to vector<8x1xf32>
    %cst_45 = arith.constant 6.400000e+01 : f32
    %106 = vector.broadcast %cst_45 : f32 to vector<8x1xf32>
    %107 = arith.divf %105, %106 : vector<8x1xf32>
    %108 = vector.broadcast %107 : vector<8x1xf32> to vector<8x64xf32>
    %109 = arith.subf %103, %108 : vector<8x64xf32>
    %110 = arith.mulf %109, %109 : vector<8x64xf32>
    %cst_46 = arith.constant dense<0.000000e+00> : vector<8xf32>
    %111 = vector.multi_reduction <add>, %110, %cst_46 [1] : vector<8x64xf32> to vector<8xf32>
    %112 = vector.shape_cast %111 : vector<8xf32> to vector<8x1xf32>
    %cst_47 = arith.constant 6.400000e+01 : f32
    %113 = vector.broadcast %cst_47 : f32 to vector<8x1xf32>
    %114 = arith.divf %112, %113 : vector<8x1xf32>
    %115 = vector.broadcast %107 : vector<8x1xf32> to vector<8x64xf32>
    %116 = arith.subf %103, %115 : vector<8x64xf32>
    %cst_48 = arith.constant 9.99999974E-6 : f32
    %117 = vector.broadcast %cst_48 : f32 to vector<8x1xf32>
    %118 = arith.addf %114, %117 : vector<8x1xf32>
    %119 = math.rsqrt %118 : vector<8x1xf32>
    %120 = vector.broadcast %119 : vector<8x1xf32> to vector<8x64xf32>
    %121 = arith.mulf %116, %120 : vector<8x64xf32>
    %c9 = arith.constant 9 : index
    %c0_49 = arith.constant 0 : index
    %122 = vector.load %arg2[%c9, %c0_49] : memref<39x128xf32, #tpu.memory_space<vmem>>, vector<1x128xf32>
    %123 = vector.extract_strided_slice %122 {offsets = [0, 0], sizes = [1, 64], strides = [1, 1]} : vector<1x128xf32> to vector<1x64xf32>
    %124 = vector.broadcast %123 : vector<1x64xf32> to vector<8x64xf32>
    %125 = arith.mulf %121, %124 : vector<8x64xf32>
    %c10 = arith.constant 10 : index
    %c0_50 = arith.constant 0 : index
    %126 = vector.load %arg2[%c10, %c0_50] : memref<39x128xf32, #tpu.memory_space<vmem>>, vector<1x128xf32>
    %127 = vector.extract_strided_slice %126 {offsets = [0, 0], sizes = [1, 64], strides = [1, 1]} : vector<1x128xf32> to vector<1x64xf32>
    %128 = vector.broadcast %127 : vector<1x64xf32> to vector<8x64xf32>
    %129 = arith.addf %125, %128 : vector<8x64xf32>
    %c0_51 = arith.constant 0 : index
    %c0_52 = arith.constant 0 : index
    %c0_53 = arith.constant 0 : index
    %130 = vector.load %arg5[%c0_51, %c0_52, %c0_53] : memref<4x64x128xf32, #tpu.memory_space<vmem>>, vector<1x64x128xf32>
    %131 = vector.shape_cast %130 : vector<1x64x128xf32> to vector<64x128xf32>
    %cst_54 = arith.constant dense<0.000000e+00> : vector<8x128xf32>
    %132 = tpu.matmul %129, %131, %cst_54 {dimension_numbers = #tpu.dot_dimension_numbers<[1], [0], [0], [1], [0, 0, 1, 1], [], []>} : vector<8x64xf32>, vector<64x128xf32>, vector<8x128xf32> -> vector<8x128xf32>
    %c11 = arith.constant 11 : index
    %c0_55 = arith.constant 0 : index
    %133 = vector.load %arg2[%c11, %c0_55] : memref<39x128xf32, #tpu.memory_space<vmem>>, vector<1x128xf32>
    %134 = vector.broadcast %133 : vector<1x128xf32> to vector<8x128xf32>
    %135 = arith.addf %132, %134 : vector<8x128xf32>
    %cst_56 = arith.constant 5.000000e-01 : f32
    %136 = vector.broadcast %cst_56 : f32 to vector<8x128xf32>
    %137 = arith.mulf %136, %135 : vector<8x128xf32>
    %cst_57 = arith.constant 4.471500e-02 : f32
    %138 = vector.broadcast %cst_57 : f32 to vector<8x128xf32>
    %139 = arith.mulf %138, %135 : vector<8x128xf32>
    %140 = arith.mulf %139, %135 : vector<8x128xf32>
    %141 = arith.mulf %140, %135 : vector<8x128xf32>
    %142 = arith.addf %135, %141 : vector<8x128xf32>
    %cst_58 = arith.constant 0.797884583 : f32
    %143 = vector.broadcast %cst_58 : f32 to vector<8x128xf32>
    %144 = arith.mulf %143, %142 : vector<8x128xf32>
    %145 = math.tanh %144 : vector<8x128xf32>
    %cst_59 = arith.constant 1.000000e+00 : f32
    %146 = vector.broadcast %cst_59 : f32 to vector<8x128xf32>
    %147 = arith.addf %146, %145 : vector<8x128xf32>
    %148 = arith.mulf %137, %147 : vector<8x128xf32>
    %c0_60 = arith.constant 0 : index
    %c0_61 = arith.constant 0 : index
    %c0_62 = arith.constant 0 : index
    %149 = vector.load %arg6[%c0_60, %c0_61, %c0_62] : memref<4x128x64xf32, #tpu.memory_space<vmem>>, vector<1x128x64xf32>
    %150 = vector.shape_cast %149 : vector<1x128x64xf32> to vector<128x64xf32>
    %cst_63 = arith.constant dense<0.000000e+00> : vector<8x64xf32>
    %151 = tpu.matmul %148, %150, %cst_63 {dimension_numbers = #tpu.dot_dimension_numbers<[1], [0], [0], [1], [0, 0, 1, 1], [], []>} : vector<8x128xf32>, vector<128x64xf32>, vector<8x64xf32> -> vector<8x64xf32>
    %152 = arith.addf %129, %151 : vector<8x64xf32>
    %c12 = arith.constant 12 : index
    %c0_64 = arith.constant 0 : index
    %153 = vector.load %arg2[%c12, %c0_64] : memref<39x128xf32, #tpu.memory_space<vmem>>, vector<1x128xf32>
    %154 = vector.extract_strided_slice %153 {offsets = [0, 0], sizes = [1, 64], strides = [1, 1]} : vector<1x128xf32> to vector<1x64xf32>
    %155 = vector.broadcast %154 : vector<1x64xf32> to vector<8x64xf32>
    %156 = arith.addf %152, %155 : vector<8x64xf32>
    %cst_65 = arith.constant dense<0.000000e+00> : vector<8xf32>
    %157 = vector.multi_reduction <add>, %156, %cst_65 [1] : vector<8x64xf32> to vector<8xf32>
    %158 = vector.shape_cast %157 : vector<8xf32> to vector<8x1xf32>
    %cst_66 = arith.constant 6.400000e+01 : f32
    %159 = vector.broadcast %cst_66 : f32 to vector<8x1xf32>
    %160 = arith.divf %158, %159 : vector<8x1xf32>
    %161 = vector.broadcast %160 : vector<8x1xf32> to vector<8x64xf32>
    %162 = arith.subf %156, %161 : vector<8x64xf32>
    %163 = arith.mulf %162, %162 : vector<8x64xf32>
    %cst_67 = arith.constant dense<0.000000e+00> : vector<8xf32>
    %164 = vector.multi_reduction <add>, %163, %cst_67 [1] : vector<8x64xf32> to vector<8xf32>
    %165 = vector.shape_cast %164 : vector<8xf32> to vector<8x1xf32>
    %cst_68 = arith.constant 6.400000e+01 : f32
    %166 = vector.broadcast %cst_68 : f32 to vector<8x1xf32>
    %167 = arith.divf %165, %166 : vector<8x1xf32>
    %168 = vector.broadcast %160 : vector<8x1xf32> to vector<8x64xf32>
    %169 = arith.subf %156, %168 : vector<8x64xf32>
    %cst_69 = arith.constant 9.99999974E-6 : f32
    %170 = vector.broadcast %cst_69 : f32 to vector<8x1xf32>
    %171 = arith.addf %167, %170 : vector<8x1xf32>
    %172 = math.rsqrt %171 : vector<8x1xf32>
    %173 = vector.broadcast %172 : vector<8x1xf32> to vector<8x64xf32>
    %174 = arith.mulf %169, %173 : vector<8x64xf32>
    %c13 = arith.constant 13 : index
    %c0_70 = arith.constant 0 : index
    %175 = vector.load %arg2[%c13, %c0_70] : memref<39x128xf32, #tpu.memory_space<vmem>>, vector<1x128xf32>
    %176 = vector.extract_strided_slice %175 {offsets = [0, 0], sizes = [1, 64], strides = [1, 1]} : vector<1x128xf32> to vector<1x64xf32>
    %177 = vector.broadcast %176 : vector<1x64xf32> to vector<8x64xf32>
    %178 = arith.mulf %174, %177 : vector<8x64xf32>
    %c14 = arith.constant 14 : index
    %c0_71 = arith.constant 0 : index
    %179 = vector.load %arg2[%c14, %c0_71] : memref<39x128xf32, #tpu.memory_space<vmem>>, vector<1x128xf32>
    %180 = vector.extract_strided_slice %179 {offsets = [0, 0], sizes = [1, 64], strides = [1, 1]} : vector<1x128xf32> to vector<1x64xf32>
    %181 = vector.broadcast %180 : vector<1x64xf32> to vector<8x64xf32>
    %182 = arith.addf %178, %181 : vector<8x64xf32>
    %c2_72 = arith.constant 2 : index
    %c0_73 = arith.constant 0 : index
    %c0_74 = arith.constant 0 : index
    %183 = vector.load %arg5[%c2_72, %c0_73, %c0_74] : memref<4x64x128xf32, #tpu.memory_space<vmem>>, vector<1x64x128xf32>
    %184 = vector.shape_cast %183 : vector<1x64x128xf32> to vector<64x128xf32>
    %cst_75 = arith.constant dense<0.000000e+00> : vector<8x128xf32>
    %185 = tpu.matmul %182, %184, %cst_75 {dimension_numbers = #tpu.dot_dimension_numbers<[1], [0], [0], [1], [0, 0, 1, 1], [], []>} : vector<8x64xf32>, vector<64x128xf32>, vector<8x128xf32> -> vector<8x128xf32>
    %c15 = arith.constant 15 : index
    %c0_76 = arith.constant 0 : index
    %186 = vector.load %arg2[%c15, %c0_76] : memref<39x128xf32, #tpu.memory_space<vmem>>, vector<1x128xf32>
    %187 = vector.broadcast %186 : vector<1x128xf32> to vector<8x128xf32>
    %188 = arith.addf %185, %187 : vector<8x128xf32>
    %cst_77 = arith.constant 5.000000e-01 : f32
    %189 = vector.broadcast %cst_77 : f32 to vector<8x128xf32>
    %190 = arith.mulf %189, %188 : vector<8x128xf32>
    %cst_78 = arith.constant 4.471500e-02 : f32
    %191 = vector.broadcast %cst_78 : f32 to vector<8x128xf32>
    %192 = arith.mulf %191, %188 : vector<8x128xf32>
    %193 = arith.mulf %192, %188 : vector<8x128xf32>
    %194 = arith.mulf %193, %188 : vector<8x128xf32>
    %195 = arith.addf %188, %194 : vector<8x128xf32>
    %cst_79 = arith.constant 0.797884583 : f32
    %196 = vector.broadcast %cst_79 : f32 to vector<8x128xf32>
    %197 = arith.mulf %196, %195 : vector<8x128xf32>
    %198 = math.tanh %197 : vector<8x128xf32>
    %cst_80 = arith.constant 1.000000e+00 : f32
    %199 = vector.broadcast %cst_80 : f32 to vector<8x128xf32>
    %200 = arith.addf %199, %198 : vector<8x128xf32>
    %201 = arith.mulf %190, %200 : vector<8x128xf32>
    %cst_81 = arith.constant dense<0.000000e+00> : vector<8xf32>
    %202 = vector.multi_reduction <add>, %201, %cst_81 [1] : vector<8x128xf32> to vector<8xf32>
    %203 = vector.shape_cast %202 : vector<8xf32> to vector<8x1xf32>
    %cst_82 = arith.constant 1.280000e+02 : f32
    %204 = vector.broadcast %cst_82 : f32 to vector<8x1xf32>
    %205 = arith.divf %203, %204 : vector<8x1xf32>
    %206 = vector.broadcast %205 : vector<8x1xf32> to vector<8x128xf32>
    %207 = arith.subf %201, %206 : vector<8x128xf32>
    %208 = arith.mulf %207, %207 : vector<8x128xf32>
    %cst_83 = arith.constant dense<0.000000e+00> : vector<8xf32>
    %209 = vector.multi_reduction <add>, %208, %cst_83 [1] : vector<8x128xf32> to vector<8xf32>
    %210 = vector.shape_cast %209 : vector<8xf32> to vector<8x1xf32>
    %cst_84 = arith.constant 1.280000e+02 : f32
    %211 = vector.broadcast %cst_84 : f32 to vector<8x1xf32>
    %212 = arith.divf %210, %211 : vector<8x1xf32>
    %213 = vector.broadcast %205 : vector<8x1xf32> to vector<8x128xf32>
    %214 = arith.subf %201, %213 : vector<8x128xf32>
    %cst_85 = arith.constant 9.99999974E-6 : f32
    %215 = vector.broadcast %cst_85 : f32 to vector<8x1xf32>
    %216 = arith.addf %212, %215 : vector<8x1xf32>
    %217 = math.rsqrt %216 : vector<8x1xf32>
    %218 = vector.broadcast %217 : vector<8x1xf32> to vector<8x128xf32>
    %219 = arith.mulf %214, %218 : vector<8x128xf32>
    %c16 = arith.constant 16 : index
    %c0_86 = arith.constant 0 : index
    %220 = vector.load %arg2[%c16, %c0_86] : memref<39x128xf32, #tpu.memory_space<vmem>>, vector<1x128xf32>
    %221 = vector.broadcast %220 : vector<1x128xf32> to vector<8x128xf32>
    %222 = arith.mulf %219, %221 : vector<8x128xf32>
    %c17 = arith.constant 17 : index
    %c0_87 = arith.constant 0 : index
    %223 = vector.load %arg2[%c17, %c0_87] : memref<39x128xf32, #tpu.memory_space<vmem>>, vector<1x128xf32>
    %224 = vector.broadcast %223 : vector<1x128xf32> to vector<8x128xf32>
    %225 = arith.addf %222, %224 : vector<8x128xf32>
    %c2_88 = arith.constant 2 : index
    %c0_89 = arith.constant 0 : index
    %c0_90 = arith.constant 0 : index
    %226 = vector.load %arg6[%c2_88, %c0_89, %c0_90] : memref<4x128x64xf32, #tpu.memory_space<vmem>>, vector<1x128x64xf32>
    %227 = vector.shape_cast %226 : vector<1x128x64xf32> to vector<128x64xf32>
    %cst_91 = arith.constant dense<0.000000e+00> : vector<8x64xf32>
    %228 = tpu.matmul %225, %227, %cst_91 {dimension_numbers = #tpu.dot_dimension_numbers<[1], [0], [0], [1], [0, 0, 1, 1], [], []>} : vector<8x128xf32>, vector<128x64xf32>, vector<8x64xf32> -> vector<8x64xf32>
    %c18 = arith.constant 18 : index
    %c0_92 = arith.constant 0 : index
    %229 = vector.load %arg2[%c18, %c0_92] : memref<39x128xf32, #tpu.memory_space<vmem>>, vector<1x128xf32>
    %230 = vector.extract_strided_slice %229 {offsets = [0, 0], sizes = [1, 64], strides = [1, 1]} : vector<1x128xf32> to vector<1x64xf32>
    %231 = vector.broadcast %230 : vector<1x64xf32> to vector<8x64xf32>
    %232 = arith.addf %228, %231 : vector<8x64xf32>
    %cst_93 = arith.constant 5.000000e-01 : f32
    %233 = vector.broadcast %cst_93 : f32 to vector<8x64xf32>
    %234 = arith.mulf %233, %232 : vector<8x64xf32>
    %cst_94 = arith.constant 4.471500e-02 : f32
    %235 = vector.broadcast %cst_94 : f32 to vector<8x64xf32>
    %236 = arith.mulf %235, %232 : vector<8x64xf32>
    %237 = arith.mulf %236, %232 : vector<8x64xf32>
    %238 = arith.mulf %237, %232 : vector<8x64xf32>
    %239 = arith.addf %232, %238 : vector<8x64xf32>
    %cst_95 = arith.constant 0.797884583 : f32
    %240 = vector.broadcast %cst_95 : f32 to vector<8x64xf32>
    %241 = arith.mulf %240, %239 : vector<8x64xf32>
    %242 = math.tanh %241 : vector<8x64xf32>
    %cst_96 = arith.constant 1.000000e+00 : f32
    %243 = vector.broadcast %cst_96 : f32 to vector<8x64xf32>
    %244 = arith.addf %243, %242 : vector<8x64xf32>
    %245 = arith.mulf %234, %244 : vector<8x64xf32>
    %cst_97 = arith.constant dense<0.000000e+00> : vector<8xf32>
    %246 = vector.multi_reduction <add>, %245, %cst_97 [1] : vector<8x64xf32> to vector<8xf32>
    %247 = vector.shape_cast %246 : vector<8xf32> to vector<8x1xf32>
    %cst_98 = arith.constant 6.400000e+01 : f32
    %248 = vector.broadcast %cst_98 : f32 to vector<8x1xf32>
    %249 = arith.divf %247, %248 : vector<8x1xf32>
    %250 = vector.broadcast %249 : vector<8x1xf32> to vector<8x64xf32>
    %251 = arith.subf %245, %250 : vector<8x64xf32>
    %252 = arith.mulf %251, %251 : vector<8x64xf32>
    %cst_99 = arith.constant dense<0.000000e+00> : vector<8xf32>
    %253 = vector.multi_reduction <add>, %252, %cst_99 [1] : vector<8x64xf32> to vector<8xf32>
    %254 = vector.shape_cast %253 : vector<8xf32> to vector<8x1xf32>
    %cst_100 = arith.constant 6.400000e+01 : f32
    %255 = vector.broadcast %cst_100 : f32 to vector<8x1xf32>
    %256 = arith.divf %254, %255 : vector<8x1xf32>
    %257 = vector.broadcast %249 : vector<8x1xf32> to vector<8x64xf32>
    %258 = arith.subf %245, %257 : vector<8x64xf32>
    %cst_101 = arith.constant 9.99999974E-6 : f32
    %259 = vector.broadcast %cst_101 : f32 to vector<8x1xf32>
    %260 = arith.addf %256, %259 : vector<8x1xf32>
    %261 = math.rsqrt %260 : vector<8x1xf32>
    %262 = vector.broadcast %261 : vector<8x1xf32> to vector<8x64xf32>
    %263 = arith.mulf %258, %262 : vector<8x64xf32>
    %c19 = arith.constant 19 : index
    %c0_102 = arith.constant 0 : index
    %264 = vector.load %arg2[%c19, %c0_102] : memref<39x128xf32, #tpu.memory_space<vmem>>, vector<1x128xf32>
    %265 = vector.extract_strided_slice %264 {offsets = [0, 0], sizes = [1, 64], strides = [1, 1]} : vector<1x128xf32> to vector<1x64xf32>
    %266 = vector.broadcast %265 : vector<1x64xf32> to vector<8x64xf32>
    %267 = arith.mulf %263, %266 : vector<8x64xf32>
    %c20 = arith.constant 20 : index
    %c0_103 = arith.constant 0 : index
    %268 = vector.load %arg2[%c20, %c0_103] : memref<39x128xf32, #tpu.memory_space<vmem>>, vector<1x128xf32>
    %269 = vector.extract_strided_slice %268 {offsets = [0, 0], sizes = [1, 64], strides = [1, 1]} : vector<1x128xf32> to vector<1x64xf32>
    %270 = vector.broadcast %269 : vector<1x64xf32> to vector<8x64xf32>
    %271 = arith.addf %267, %270 : vector<8x64xf32>
    %272 = arith.addf %182, %271 : vector<8x64xf32>
    %c4_104 = arith.constant 4 : index
    %c0_105 = arith.constant 0 : index
    %c0_106 = arith.constant 0 : index
    %273 = vector.load %arg4[%c4_104, %c0_105, %c0_106] : memref<5x64x64xf32, #tpu.memory_space<vmem>>, vector<1x64x64xf32>
    %274 = vector.shape_cast %273 : vector<1x64x64xf32> to vector<64x64xf32>
    %cst_107 = arith.constant dense<0.000000e+00> : vector<8x64xf32>
    %275 = tpu.matmul %272, %274, %cst_107 {dimension_numbers = #tpu.dot_dimension_numbers<[1], [0], [0], [1], [0, 0, 1, 1], [], []>} : vector<8x64xf32>, vector<64x64xf32>, vector<8x64xf32> -> vector<8x64xf32>
    %c21 = arith.constant 21 : index
    %c0_108 = arith.constant 0 : index
    %276 = vector.load %arg2[%c21, %c0_108] : memref<39x128xf32, #tpu.memory_space<vmem>>, vector<1x128xf32>
    %277 = vector.extract_strided_slice %276 {offsets = [0, 0], sizes = [1, 64], strides = [1, 1]} : vector<1x128xf32> to vector<1x64xf32>
    %278 = vector.broadcast %277 : vector<1x64xf32> to vector<8x64xf32>
    %279 = arith.addf %275, %278 : vector<8x64xf32>
    %280 = arith.addf %272, %279 : vector<8x64xf32>
    %cst_109 = arith.constant dense<0.000000e+00> : vector<8xf32>
    %281 = vector.multi_reduction <add>, %280, %cst_109 [1] : vector<8x64xf32> to vector<8xf32>
    %282 = vector.shape_cast %281 : vector<8xf32> to vector<8x1xf32>
    %cst_110 = arith.constant 6.400000e+01 : f32
    %283 = vector.broadcast %cst_110 : f32 to vector<8x1xf32>
    %284 = arith.divf %282, %283 : vector<8x1xf32>
    %285 = vector.broadcast %284 : vector<8x1xf32> to vector<8x64xf32>
    %286 = arith.subf %280, %285 : vector<8x64xf32>
    %287 = arith.mulf %286, %286 : vector<8x64xf32>
    %cst_111 = arith.constant dense<0.000000e+00> : vector<8xf32>
    %288 = vector.multi_reduction <add>, %287, %cst_111 [1] : vector<8x64xf32> to vector<8xf32>
    %289 = vector.shape_cast %288 : vector<8xf32> to vector<8x1xf32>
    %cst_112 = arith.constant 6.400000e+01 : f32
    %290 = vector.broadcast %cst_112 : f32 to vector<8x1xf32>
    %291 = arith.divf %289, %290 : vector<8x1xf32>
    %292 = vector.broadcast %284 : vector<8x1xf32> to vector<8x64xf32>
    %293 = arith.subf %280, %292 : vector<8x64xf32>
    %cst_113 = arith.constant 9.99999974E-6 : f32
    %294 = vector.broadcast %cst_113 : f32 to vector<8x1xf32>
    %295 = arith.addf %291, %294 : vector<8x1xf32>
    %296 = math.rsqrt %295 : vector<8x1xf32>
    %297 = vector.broadcast %296 : vector<8x1xf32> to vector<8x64xf32>
    %298 = arith.mulf %293, %297 : vector<8x64xf32>
    %c22 = arith.constant 22 : index
    %c0_114 = arith.constant 0 : index
    %299 = vector.load %arg2[%c22, %c0_114] : memref<39x128xf32, #tpu.memory_space<vmem>>, vector<1x128xf32>
    %300 = vector.extract_strided_slice %299 {offsets = [0, 0], sizes = [1, 64], strides = [1, 1]} : vector<1x128xf32> to vector<1x64xf32>
    %301 = vector.broadcast %300 : vector<1x64xf32> to vector<8x64xf32>
    %302 = arith.mulf %298, %301 : vector<8x64xf32>
    %c23 = arith.constant 23 : index
    %c0_115 = arith.constant 0 : index
    %303 = vector.load %arg2[%c23, %c0_115] : memref<39x128xf32, #tpu.memory_space<vmem>>, vector<1x128xf32>
    %304 = vector.extract_strided_slice %303 {offsets = [0, 0], sizes = [1, 64], strides = [1, 1]} : vector<1x128xf32> to vector<1x64xf32>
    %305 = vector.broadcast %304 : vector<1x64xf32> to vector<8x64xf32>
    %306 = arith.addf %302, %305 : vector<8x64xf32>
    %c1_116 = arith.constant 1 : index
    %c0_117 = arith.constant 0 : index
    %c0_118 = arith.constant 0 : index
    %307 = vector.load %arg5[%c1_116, %c0_117, %c0_118] : memref<4x64x128xf32, #tpu.memory_space<vmem>>, vector<1x64x128xf32>
    %308 = vector.shape_cast %307 : vector<1x64x128xf32> to vector<64x128xf32>
    %cst_119 = arith.constant dense<0.000000e+00> : vector<8x128xf32>
    %309 = tpu.matmul %306, %308, %cst_119 {dimension_numbers = #tpu.dot_dimension_numbers<[1], [0], [0], [1], [0, 0, 1, 1], [], []>} : vector<8x64xf32>, vector<64x128xf32>, vector<8x128xf32> -> vector<8x128xf32>
    %c24 = arith.constant 24 : index
    %c0_120 = arith.constant 0 : index
    %310 = vector.load %arg2[%c24, %c0_120] : memref<39x128xf32, #tpu.memory_space<vmem>>, vector<1x128xf32>
    %311 = vector.broadcast %310 : vector<1x128xf32> to vector<8x128xf32>
    %312 = arith.addf %309, %311 : vector<8x128xf32>
    %cst_121 = arith.constant 5.000000e-01 : f32
    %313 = vector.broadcast %cst_121 : f32 to vector<8x128xf32>
    %314 = arith.mulf %313, %312 : vector<8x128xf32>
    %cst_122 = arith.constant 4.471500e-02 : f32
    %315 = vector.broadcast %cst_122 : f32 to vector<8x128xf32>
    %316 = arith.mulf %315, %312 : vector<8x128xf32>
    %317 = arith.mulf %316, %312 : vector<8x128xf32>
    %318 = arith.mulf %317, %312 : vector<8x128xf32>
    %319 = arith.addf %312, %318 : vector<8x128xf32>
    %cst_123 = arith.constant 0.797884583 : f32
    %320 = vector.broadcast %cst_123 : f32 to vector<8x128xf32>
    %321 = arith.mulf %320, %319 : vector<8x128xf32>
    %322 = math.tanh %321 : vector<8x128xf32>
    %cst_124 = arith.constant 1.000000e+00 : f32
    %323 = vector.broadcast %cst_124 : f32 to vector<8x128xf32>
    %324 = arith.addf %323, %322 : vector<8x128xf32>
    %325 = arith.mulf %314, %324 : vector<8x128xf32>
    %c1_125 = arith.constant 1 : index
    %c0_126 = arith.constant 0 : index
    %c0_127 = arith.constant 0 : index
    %326 = vector.load %arg6[%c1_125, %c0_126, %c0_127] : memref<4x128x64xf32, #tpu.memory_space<vmem>>, vector<1x128x64xf32>
    %327 = vector.shape_cast %326 : vector<1x128x64xf32> to vector<128x64xf32>
    %cst_128 = arith.constant dense<0.000000e+00> : vector<8x64xf32>
    %328 = tpu.matmul %325, %327, %cst_128 {dimension_numbers = #tpu.dot_dimension_numbers<[1], [0], [0], [1], [0, 0, 1, 1], [], []>} : vector<8x128xf32>, vector<128x64xf32>, vector<8x64xf32> -> vector<8x64xf32>
    %329 = arith.addf %306, %328 : vector<8x64xf32>
    %c25 = arith.constant 25 : index
    %c0_129 = arith.constant 0 : index
    %330 = vector.load %arg2[%c25, %c0_129] : memref<39x128xf32, #tpu.memory_space<vmem>>, vector<1x128xf32>
    %331 = vector.extract_strided_slice %330 {offsets = [0, 0], sizes = [1, 64], strides = [1, 1]} : vector<1x128xf32> to vector<1x64xf32>
    %332 = vector.broadcast %331 : vector<1x64xf32> to vector<8x64xf32>
    %333 = arith.addf %329, %332 : vector<8x64xf32>
    %cst_130 = arith.constant dense<0.000000e+00> : vector<8xf32>
    %334 = vector.multi_reduction <add>, %333, %cst_130 [1] : vector<8x64xf32> to vector<8xf32>
    %335 = vector.shape_cast %334 : vector<8xf32> to vector<8x1xf32>
    %cst_131 = arith.constant 6.400000e+01 : f32
    %336 = vector.broadcast %cst_131 : f32 to vector<8x1xf32>
    %337 = arith.divf %335, %336 : vector<8x1xf32>
    %338 = vector.broadcast %337 : vector<8x1xf32> to vector<8x64xf32>
    %339 = arith.subf %333, %338 : vector<8x64xf32>
    %340 = arith.mulf %339, %339 : vector<8x64xf32>
    %cst_132 = arith.constant dense<0.000000e+00> : vector<8xf32>
    %341 = vector.multi_reduction <add>, %340, %cst_132 [1] : vector<8x64xf32> to vector<8xf32>
    %342 = vector.shape_cast %341 : vector<8xf32> to vector<8x1xf32>
    %cst_133 = arith.constant 6.400000e+01 : f32
    %343 = vector.broadcast %cst_133 : f32 to vector<8x1xf32>
    %344 = arith.divf %342, %343 : vector<8x1xf32>
    %345 = vector.broadcast %337 : vector<8x1xf32> to vector<8x64xf32>
    %346 = arith.subf %333, %345 : vector<8x64xf32>
    %cst_134 = arith.constant 9.99999974E-6 : f32
    %347 = vector.broadcast %cst_134 : f32 to vector<8x1xf32>
    %348 = arith.addf %344, %347 : vector<8x1xf32>
    %349 = math.rsqrt %348 : vector<8x1xf32>
    %350 = vector.broadcast %349 : vector<8x1xf32> to vector<8x64xf32>
    %351 = arith.mulf %346, %350 : vector<8x64xf32>
    %c26 = arith.constant 26 : index
    %c0_135 = arith.constant 0 : index
    %352 = vector.load %arg2[%c26, %c0_135] : memref<39x128xf32, #tpu.memory_space<vmem>>, vector<1x128xf32>
    %353 = vector.extract_strided_slice %352 {offsets = [0, 0], sizes = [1, 64], strides = [1, 1]} : vector<1x128xf32> to vector<1x64xf32>
    %354 = vector.broadcast %353 : vector<1x64xf32> to vector<8x64xf32>
    %355 = arith.mulf %351, %354 : vector<8x64xf32>
    %c27 = arith.constant 27 : index
    %c0_136 = arith.constant 0 : index
    %356 = vector.load %arg2[%c27, %c0_136] : memref<39x128xf32, #tpu.memory_space<vmem>>, vector<1x128xf32>
    %357 = vector.extract_strided_slice %356 {offsets = [0, 0], sizes = [1, 64], strides = [1, 1]} : vector<1x128xf32> to vector<1x64xf32>
    %358 = vector.broadcast %357 : vector<1x64xf32> to vector<8x64xf32>
    %359 = arith.addf %355, %358 : vector<8x64xf32>
    %c3_137 = arith.constant 3 : index
    %c0_138 = arith.constant 0 : index
    %c0_139 = arith.constant 0 : index
    %360 = vector.load %arg5[%c3_137, %c0_138, %c0_139] : memref<4x64x128xf32, #tpu.memory_space<vmem>>, vector<1x64x128xf32>
    %361 = vector.shape_cast %360 : vector<1x64x128xf32> to vector<64x128xf32>
    %cst_140 = arith.constant dense<0.000000e+00> : vector<8x128xf32>
    %362 = tpu.matmul %359, %361, %cst_140 {dimension_numbers = #tpu.dot_dimension_numbers<[1], [0], [0], [1], [0, 0, 1, 1], [], []>} : vector<8x64xf32>, vector<64x128xf32>, vector<8x128xf32> -> vector<8x128xf32>
    %c28 = arith.constant 28 : index
    %c0_141 = arith.constant 0 : index
    %363 = vector.load %arg2[%c28, %c0_141] : memref<39x128xf32, #tpu.memory_space<vmem>>, vector<1x128xf32>
    %364 = vector.broadcast %363 : vector<1x128xf32> to vector<8x128xf32>
    %365 = arith.addf %362, %364 : vector<8x128xf32>
    %cst_142 = arith.constant 5.000000e-01 : f32
    %366 = vector.broadcast %cst_142 : f32 to vector<8x128xf32>
    %367 = arith.mulf %366, %365 : vector<8x128xf32>
    %cst_143 = arith.constant 4.471500e-02 : f32
    %368 = vector.broadcast %cst_143 : f32 to vector<8x128xf32>
    %369 = arith.mulf %368, %365 : vector<8x128xf32>
    %370 = arith.mulf %369, %365 : vector<8x128xf32>
    %371 = arith.mulf %370, %365 : vector<8x128xf32>
    %372 = arith.addf %365, %371 : vector<8x128xf32>
    %cst_144 = arith.constant 0.797884583 : f32
    %373 = vector.broadcast %cst_144 : f32 to vector<8x128xf32>
    %374 = arith.mulf %373, %372 : vector<8x128xf32>
    %375 = math.tanh %374 : vector<8x128xf32>
    %cst_145 = arith.constant 1.000000e+00 : f32
    %376 = vector.broadcast %cst_145 : f32 to vector<8x128xf32>
    %377 = arith.addf %376, %375 : vector<8x128xf32>
    %378 = arith.mulf %367, %377 : vector<8x128xf32>
    %cst_146 = arith.constant dense<0.000000e+00> : vector<8xf32>
    %379 = vector.multi_reduction <add>, %378, %cst_146 [1] : vector<8x128xf32> to vector<8xf32>
    %380 = vector.shape_cast %379 : vector<8xf32> to vector<8x1xf32>
    %cst_147 = arith.constant 1.280000e+02 : f32
    %381 = vector.broadcast %cst_147 : f32 to vector<8x1xf32>
    %382 = arith.divf %380, %381 : vector<8x1xf32>
    %383 = vector.broadcast %382 : vector<8x1xf32> to vector<8x128xf32>
    %384 = arith.subf %378, %383 : vector<8x128xf32>
    %385 = arith.mulf %384, %384 : vector<8x128xf32>
    %cst_148 = arith.constant dense<0.000000e+00> : vector<8xf32>
    %386 = vector.multi_reduction <add>, %385, %cst_148 [1] : vector<8x128xf32> to vector<8xf32>
    %387 = vector.shape_cast %386 : vector<8xf32> to vector<8x1xf32>
    %cst_149 = arith.constant 1.280000e+02 : f32
    %388 = vector.broadcast %cst_149 : f32 to vector<8x1xf32>
    %389 = arith.divf %387, %388 : vector<8x1xf32>
    %390 = vector.broadcast %382 : vector<8x1xf32> to vector<8x128xf32>
    %391 = arith.subf %378, %390 : vector<8x128xf32>
    %cst_150 = arith.constant 9.99999974E-6 : f32
    %392 = vector.broadcast %cst_150 : f32 to vector<8x1xf32>
    %393 = arith.addf %389, %392 : vector<8x1xf32>
    %394 = math.rsqrt %393 : vector<8x1xf32>
    %395 = vector.broadcast %394 : vector<8x1xf32> to vector<8x128xf32>
    %396 = arith.mulf %391, %395 : vector<8x128xf32>
    %c29 = arith.constant 29 : index
    %c0_151 = arith.constant 0 : index
    %397 = vector.load %arg2[%c29, %c0_151] : memref<39x128xf32, #tpu.memory_space<vmem>>, vector<1x128xf32>
    %398 = vector.broadcast %397 : vector<1x128xf32> to vector<8x128xf32>
    %399 = arith.mulf %396, %398 : vector<8x128xf32>
    %c30 = arith.constant 30 : index
    %c0_152 = arith.constant 0 : index
    %400 = vector.load %arg2[%c30, %c0_152] : memref<39x128xf32, #tpu.memory_space<vmem>>, vector<1x128xf32>
    %401 = vector.broadcast %400 : vector<1x128xf32> to vector<8x128xf32>
    %402 = arith.addf %399, %401 : vector<8x128xf32>
    %c3_153 = arith.constant 3 : index
    %c0_154 = arith.constant 0 : index
    %c0_155 = arith.constant 0 : index
    %403 = vector.load %arg6[%c3_153, %c0_154, %c0_155] : memref<4x128x64xf32, #tpu.memory_space<vmem>>, vector<1x128x64xf32>
    %404 = vector.shape_cast %403 : vector<1x128x64xf32> to vector<128x64xf32>
    %cst_156 = arith.constant dense<0.000000e+00> : vector<8x64xf32>
    %405 = tpu.matmul %402, %404, %cst_156 {dimension_numbers = #tpu.dot_dimension_numbers<[1], [0], [0], [1], [0, 0, 1, 1], [], []>} : vector<8x128xf32>, vector<128x64xf32>, vector<8x64xf32> -> vector<8x64xf32>
    %c31 = arith.constant 31 : index
    %c0_157 = arith.constant 0 : index
    %406 = vector.load %arg2[%c31, %c0_157] : memref<39x128xf32, #tpu.memory_space<vmem>>, vector<1x128xf32>
    %407 = vector.extract_strided_slice %406 {offsets = [0, 0], sizes = [1, 64], strides = [1, 1]} : vector<1x128xf32> to vector<1x64xf32>
    %408 = vector.broadcast %407 : vector<1x64xf32> to vector<8x64xf32>
    %409 = arith.addf %405, %408 : vector<8x64xf32>
    %cst_158 = arith.constant 5.000000e-01 : f32
    %410 = vector.broadcast %cst_158 : f32 to vector<8x64xf32>
    %411 = arith.mulf %410, %409 : vector<8x64xf32>
    %cst_159 = arith.constant 4.471500e-02 : f32
    %412 = vector.broadcast %cst_159 : f32 to vector<8x64xf32>
    %413 = arith.mulf %412, %409 : vector<8x64xf32>
    %414 = arith.mulf %413, %409 : vector<8x64xf32>
    %415 = arith.mulf %414, %409 : vector<8x64xf32>
    %416 = arith.addf %409, %415 : vector<8x64xf32>
    %cst_160 = arith.constant 0.797884583 : f32
    %417 = vector.broadcast %cst_160 : f32 to vector<8x64xf32>
    %418 = arith.mulf %417, %416 : vector<8x64xf32>
    %419 = math.tanh %418 : vector<8x64xf32>
    %cst_161 = arith.constant 1.000000e+00 : f32
    %420 = vector.broadcast %cst_161 : f32 to vector<8x64xf32>
    %421 = arith.addf %420, %419 : vector<8x64xf32>
    %422 = arith.mulf %411, %421 : vector<8x64xf32>
    %cst_162 = arith.constant dense<0.000000e+00> : vector<8xf32>
    %423 = vector.multi_reduction <add>, %422, %cst_162 [1] : vector<8x64xf32> to vector<8xf32>
    %424 = vector.shape_cast %423 : vector<8xf32> to vector<8x1xf32>
    %cst_163 = arith.constant 6.400000e+01 : f32
    %425 = vector.broadcast %cst_163 : f32 to vector<8x1xf32>
    %426 = arith.divf %424, %425 : vector<8x1xf32>
    %427 = vector.broadcast %426 : vector<8x1xf32> to vector<8x64xf32>
    %428 = arith.subf %422, %427 : vector<8x64xf32>
    %429 = arith.mulf %428, %428 : vector<8x64xf32>
    %cst_164 = arith.constant dense<0.000000e+00> : vector<8xf32>
    %430 = vector.multi_reduction <add>, %429, %cst_164 [1] : vector<8x64xf32> to vector<8xf32>
    %431 = vector.shape_cast %430 : vector<8xf32> to vector<8x1xf32>
    %cst_165 = arith.constant 6.400000e+01 : f32
    %432 = vector.broadcast %cst_165 : f32 to vector<8x1xf32>
    %433 = arith.divf %431, %432 : vector<8x1xf32>
    %434 = vector.broadcast %426 : vector<8x1xf32> to vector<8x64xf32>
    %435 = arith.subf %422, %434 : vector<8x64xf32>
    %cst_166 = arith.constant 9.99999974E-6 : f32
    %436 = vector.broadcast %cst_166 : f32 to vector<8x1xf32>
    %437 = arith.addf %433, %436 : vector<8x1xf32>
    %438 = math.rsqrt %437 : vector<8x1xf32>
    %439 = vector.broadcast %438 : vector<8x1xf32> to vector<8x64xf32>
    %440 = arith.mulf %435, %439 : vector<8x64xf32>
    %c32 = arith.constant 32 : index
    %c0_167 = arith.constant 0 : index
    %441 = vector.load %arg2[%c32, %c0_167] : memref<39x128xf32, #tpu.memory_space<vmem>>, vector<1x128xf32>
    %442 = vector.extract_strided_slice %441 {offsets = [0, 0], sizes = [1, 64], strides = [1, 1]} : vector<1x128xf32> to vector<1x64xf32>
    %443 = vector.broadcast %442 : vector<1x64xf32> to vector<8x64xf32>
    %444 = arith.mulf %440, %443 : vector<8x64xf32>
    %c33 = arith.constant 33 : index
    %c0_168 = arith.constant 0 : index
    %445 = vector.load %arg2[%c33, %c0_168] : memref<39x128xf32, #tpu.memory_space<vmem>>, vector<1x128xf32>
    %446 = vector.extract_strided_slice %445 {offsets = [0, 0], sizes = [1, 64], strides = [1, 1]} : vector<1x128xf32> to vector<1x64xf32>
    %447 = vector.broadcast %446 : vector<1x64xf32> to vector<8x64xf32>
    %448 = arith.addf %444, %447 : vector<8x64xf32>
    %449 = arith.addf %359, %448 : vector<8x64xf32>
    %c0_169 = arith.constant 0 : index
    %c0_170 = arith.constant 0 : index
    %450 = vector.load %arg8[%c0_169, %c0_170] : memref<64x6xf32, #tpu.memory_space<vmem>>, vector<64x6xf32>
    %cst_171 = arith.constant dense<0.000000e+00> : vector<8x6xf32>
    %451 = tpu.matmul %449, %450, %cst_171 {dimension_numbers = #tpu.dot_dimension_numbers<[1], [0], [0], [1], [0, 0, 1, 1], [], []>} : vector<8x64xf32>, vector<64x6xf32>, vector<8x6xf32> -> vector<8x6xf32>
    %c34 = arith.constant 34 : index
    %c0_172 = arith.constant 0 : index
    %452 = vector.load %arg2[%c34, %c0_172] : memref<39x128xf32, #tpu.memory_space<vmem>>, vector<1x128xf32>
    %453 = vector.extract_strided_slice %452 {offsets = [0, 0], sizes = [1, 6], strides = [1, 1]} : vector<1x128xf32> to vector<1x6xf32>
    %454 = vector.broadcast %453 : vector<1x6xf32> to vector<8x6xf32>
    %455 = arith.addf %451, %454 : vector<8x6xf32>
    %cst_173 = arith.constant dense<0xFF800000> : vector<8xf32>
    %456 = vector.multi_reduction <maximumf>, %455, %cst_173 [1] : vector<8x6xf32> to vector<8xf32>
    %457 = vector.shape_cast %456 : vector<8xf32> to vector<8x1xf32>
    %458 = vector.broadcast %457 : vector<8x1xf32> to vector<8x6xf32>
    %459 = arith.subf %455, %458 : vector<8x6xf32>
    %460 = math.exp %459 : vector<8x6xf32>
    %461 = vector.extract_strided_slice %460 {offsets = [0, 0], sizes = [8, 3], strides = [1, 1]} : vector<8x6xf32> to vector<8x3xf32>
    %462 = vector.extract_strided_slice %460 {offsets = [0, 0], sizes = [8, 3], strides = [1, 1]} : vector<8x6xf32> to vector<8x3xf32>
    %cst_174 = arith.constant dense<0.000000e+00> : vector<8xf32>
    %463 = vector.multi_reduction <add>, %462, %cst_174 [1] : vector<8x3xf32> to vector<8xf32>
    %464 = vector.shape_cast %463 : vector<8xf32> to vector<8x1xf32>
    %465 = vector.broadcast %464 : vector<8x1xf32> to vector<8x3xf32>
    %466 = arith.divf %461, %465 : vector<8x3xf32>
    %467 = vector.extract_strided_slice %460 {offsets = [0, 3], sizes = [8, 3], strides = [1, 1]} : vector<8x6xf32> to vector<8x3xf32>
    %468 = vector.extract_strided_slice %460 {offsets = [0, 3], sizes = [8, 3], strides = [1, 1]} : vector<8x6xf32> to vector<8x3xf32>
    %cst_175 = arith.constant dense<0.000000e+00> : vector<8xf32>
    %469 = vector.multi_reduction <add>, %468, %cst_175 [1] : vector<8x3xf32> to vector<8xf32>
    %470 = vector.shape_cast %469 : vector<8xf32> to vector<8x1xf32>
    %471 = vector.broadcast %470 : vector<8x1xf32> to vector<8x3xf32>
    %472 = arith.divf %467, %471 : vector<8x3xf32>
    %c0_176 = arith.constant 0 : index
    %c0_177 = arith.constant 0 : index
    %473 = vector.load %arg7[%c0_176, %c0_177] : memref<64x32xf32, #tpu.memory_space<vmem>>, vector<64x32xf32>
    %cst_178 = arith.constant dense<0.000000e+00> : vector<8x32xf32>
    %474 = tpu.matmul %449, %473, %cst_178 {dimension_numbers = #tpu.dot_dimension_numbers<[1], [0], [0], [1], [0, 0, 1, 1], [], []>} : vector<8x64xf32>, vector<64x32xf32>, vector<8x32xf32> -> vector<8x32xf32>
    %c35 = arith.constant 35 : index
    %c0_179 = arith.constant 0 : index
    %475 = vector.load %arg2[%c35, %c0_179] : memref<39x128xf32, #tpu.memory_space<vmem>>, vector<1x128xf32>
    %476 = vector.extract_strided_slice %475 {offsets = [0, 0], sizes = [1, 32], strides = [1, 1]} : vector<1x128xf32> to vector<1x32xf32>
    %477 = vector.broadcast %476 : vector<1x32xf32> to vector<8x32xf32>
    %478 = arith.addf %474, %477 : vector<8x32xf32>
    %cst_180 = arith.constant 5.000000e-01 : f32
    %479 = vector.broadcast %cst_180 : f32 to vector<8x32xf32>
    %480 = arith.mulf %479, %478 : vector<8x32xf32>
    %cst_181 = arith.constant 4.471500e-02 : f32
    %481 = vector.broadcast %cst_181 : f32 to vector<8x32xf32>
    %482 = arith.mulf %481, %478 : vector<8x32xf32>
    %483 = arith.mulf %482, %478 : vector<8x32xf32>
    %484 = arith.mulf %483, %478 : vector<8x32xf32>
    %485 = arith.addf %478, %484 : vector<8x32xf32>
    %cst_182 = arith.constant 0.797884583 : f32
    %486 = vector.broadcast %cst_182 : f32 to vector<8x32xf32>
    %487 = arith.mulf %486, %485 : vector<8x32xf32>
    %488 = math.tanh %487 : vector<8x32xf32>
    %cst_183 = arith.constant 1.000000e+00 : f32
    %489 = vector.broadcast %cst_183 : f32 to vector<8x32xf32>
    %490 = arith.addf %489, %488 : vector<8x32xf32>
    %491 = arith.mulf %480, %490 : vector<8x32xf32>
    %cst_184 = arith.constant dense<0.000000e+00> : vector<8xf32>
    %492 = vector.multi_reduction <add>, %491, %cst_184 [1] : vector<8x32xf32> to vector<8xf32>
    %493 = vector.shape_cast %492 : vector<8xf32> to vector<8x1xf32>
    %cst_185 = arith.constant 3.200000e+01 : f32
    %494 = vector.broadcast %cst_185 : f32 to vector<8x1xf32>
    %495 = arith.divf %493, %494 : vector<8x1xf32>
    %496 = vector.broadcast %495 : vector<8x1xf32> to vector<8x32xf32>
    %497 = arith.subf %491, %496 : vector<8x32xf32>
    %498 = arith.mulf %497, %497 : vector<8x32xf32>
    %cst_186 = arith.constant dense<0.000000e+00> : vector<8xf32>
    %499 = vector.multi_reduction <add>, %498, %cst_186 [1] : vector<8x32xf32> to vector<8xf32>
    %500 = vector.shape_cast %499 : vector<8xf32> to vector<8x1xf32>
    %cst_187 = arith.constant 3.200000e+01 : f32
    %501 = vector.broadcast %cst_187 : f32 to vector<8x1xf32>
    %502 = arith.divf %500, %501 : vector<8x1xf32>
    %503 = vector.broadcast %495 : vector<8x1xf32> to vector<8x32xf32>
    %504 = arith.subf %491, %503 : vector<8x32xf32>
    %cst_188 = arith.constant 9.99999974E-6 : f32
    %505 = vector.broadcast %cst_188 : f32 to vector<8x1xf32>
    %506 = arith.addf %502, %505 : vector<8x1xf32>
    %507 = math.rsqrt %506 : vector<8x1xf32>
    %508 = vector.broadcast %507 : vector<8x1xf32> to vector<8x32xf32>
    %509 = arith.mulf %504, %508 : vector<8x32xf32>
    %c36 = arith.constant 36 : index
    %c0_189 = arith.constant 0 : index
    %510 = vector.load %arg2[%c36, %c0_189] : memref<39x128xf32, #tpu.memory_space<vmem>>, vector<1x128xf32>
    %511 = vector.extract_strided_slice %510 {offsets = [0, 0], sizes = [1, 32], strides = [1, 1]} : vector<1x128xf32> to vector<1x32xf32>
    %512 = vector.broadcast %511 : vector<1x32xf32> to vector<8x32xf32>
    %513 = arith.mulf %509, %512 : vector<8x32xf32>
    %c37 = arith.constant 37 : index
    %c0_190 = arith.constant 0 : index
    %514 = vector.load %arg2[%c37, %c0_190] : memref<39x128xf32, #tpu.memory_space<vmem>>, vector<1x128xf32>
    %515 = vector.extract_strided_slice %514 {offsets = [0, 0], sizes = [1, 32], strides = [1, 1]} : vector<1x128xf32> to vector<1x32xf32>
    %516 = vector.broadcast %515 : vector<1x32xf32> to vector<8x32xf32>
    %517 = arith.addf %513, %516 : vector<8x32xf32>
    %c0_191 = arith.constant 0 : index
    %c0_192 = arith.constant 0 : index
    %518 = vector.load %arg9[%c0_191, %c0_192] : memref<32x6xf32, #tpu.memory_space<vmem>>, vector<32x6xf32>
    %cst_193 = arith.constant dense<0.000000e+00> : vector<8x6xf32>
    %519 = tpu.matmul %517, %518, %cst_193 {dimension_numbers = #tpu.dot_dimension_numbers<[1], [0], [0], [1], [0, 0, 1, 1], [], []>} : vector<8x32xf32>, vector<32x6xf32>, vector<8x6xf32> -> vector<8x6xf32>
    %c38 = arith.constant 38 : index
    %c0_194 = arith.constant 0 : index
    %520 = vector.load %arg2[%c38, %c0_194] : memref<39x128xf32, #tpu.memory_space<vmem>>, vector<1x128xf32>
    %521 = vector.extract_strided_slice %520 {offsets = [0, 0], sizes = [1, 6], strides = [1, 1]} : vector<1x128xf32> to vector<1x6xf32>
    %522 = vector.broadcast %521 : vector<1x6xf32> to vector<8x6xf32>
    %523 = arith.addf %519, %522 : vector<8x6xf32>
    %524 = vector.extract_strided_slice %523 {offsets = [0, 0], sizes = [8, 3], strides = [1, 1]} : vector<8x6xf32> to vector<8x3xf32>
    %525 = arith.mulf %524, %466 : vector<8x3xf32>
    %c0_195 = arith.constant 0 : index
    %c0_196 = arith.constant 0 : index
    %526 = vector.load %arg10[%c0_195, %c0_196] : memref<8x6xf32, #tpu.memory_space<vmem>>, vector<8x3xf32>
    tpu.vector_store %arg10[%c0_195, %c0_196], %525 {strides = array<i32>} : memref<8x6xf32, #tpu.memory_space<vmem>>, vector<8x3xf32>,
    %527 = vector.extract_strided_slice %523 {offsets = [0, 3], sizes = [8, 3], strides = [1, 1]} : vector<8x6xf32> to vector<8x3xf32>
    %528 = arith.mulf %527, %472 : vector<8x3xf32>
    %c0_197 = arith.constant 0 : index
    %c3_198 = arith.constant 3 : index
    %529 = vector.load %arg10[%c0_197, %c3_198] : memref<8x6xf32, #tpu.memory_space<vmem>>, vector<8x3xf32>
    tpu.vector_store %arg10[%c0_197, %c3_198], %528 {strides = array<i32>} : memref<8x6xf32, #tpu.memory_space<vmem>>, vector<8x3xf32>,
    return
  }
  func.func @transform_0(%arg0: i32) -> (i32, i32) {
    %c0_i32 = arith.constant 0 : i32
    %c0_i32_0 = arith.constant 0 : i32
    return %arg0, %c0_i32 : i32, i32
  }
  func.func @transform_1(%arg0: i32) -> (i32, i32) {
    %c0_i32 = arith.constant 0 : i32
    %c0_i32_0 = arith.constant 0 : i32
    %c0_i32_1 = arith.constant 0 : i32
    return %c0_i32, %c0_i32_0 : i32, i32
  }
  func.func @transform_2(%arg0: i32) -> (i32, i32) {
    %c0_i32 = arith.constant 0 : i32
    %c0_i32_0 = arith.constant 0 : i32
    %c0_i32_1 = arith.constant 0 : i32
    return %c0_i32, %c0_i32_0 : i32, i32
  }
  func.func @transform_3(%arg0: i32) -> (i32, i32, i32) {
    %c0_i32 = arith.constant 0 : i32
    %c0_i32_0 = arith.constant 0 : i32
    %c0_i32_1 = arith.constant 0 : i32
    %c0_i32_2 = arith.constant 0 : i32
    return %c0_i32, %c0_i32_0, %c0_i32_1 : i32, i32, i32
  }
  func.func @transform_4(%arg0: i32) -> (i32, i32, i32) {
    %c0_i32 = arith.constant 0 : i32
    %c0_i32_0 = arith.constant 0 : i32
    %c0_i32_1 = arith.constant 0 : i32
    %c0_i32_2 = arith.constant 0 : i32
    return %c0_i32, %c0_i32_0, %c0_i32_1 : i32, i32, i32
  }
  func.func @transform_5(%arg0: i32) -> (i32, i32, i32) {
    %c0_i32 = arith.constant 0 : i32
    %c0_i32_0 = arith.constant 0 : i32
    %c0_i32_1 = arith.constant 0 : i32
    %c0_i32_2 = arith.constant 0 : i32
    return %c0_i32, %c0_i32_0, %c0_i32_1 : i32, i32, i32
  }
  func.func @transform_6(%arg0: i32) -> (i32, i32) {
    %c0_i32 = arith.constant 0 : i32
    %c0_i32_0 = arith.constant 0 : i32
    %c0_i32_1 = arith.constant 0 : i32
    return %c0_i32, %c0_i32_0 : i32, i32
  }
  func.func @transform_7(%arg0: i32) -> (i32, i32) {
    %c0_i32 = arith.constant 0 : i32
    %c0_i32_0 = arith.constant 0 : i32
    %c0_i32_1 = arith.constant 0 : i32
    return %c0_i32, %c0_i32_0 : i32, i32
  }
  func.func @transform_8(%arg0: i32) -> (i32, i32) {
    %c0_i32 = arith.constant 0 : i32
    %c0_i32_0 = arith.constant 0 : i32
    %c0_i32_1 = arith.constant 0 : i32
    return %c0_i32, %c0_i32_0 : i32, i32
  }
  func.func @transform_9(%arg0: i32) -> (i32, i32) {
    %c0_i32 = arith.constant 0 : i32
    %c0_i32_0 = arith.constant 0 : i32
    return %arg0, %c0_i32 : i32, i32
  }
}

</mosaic_0001>

<bundles_post_ra>
// kernel: tpu_custom_call.1
= control target key start
LH: loop header
LB: loop body
LE: loop exit
PB: predicated region body
PF: predicated region fallthrough
CT: control target
= control target key end

     0   :  { %s3454_s30 = smov 0   ;;  %s4242_s0 = inlined_call_operand.vmem [shape: f32[32,41], index: 0, kind: input, shape index: {}]   ;;  %s4243_s1 = inlined_call_operand.vmem [shape: f32[39,128], index: 1, kind: input, shape index: {}]   ;;  %s4244_s2 = inlined_call_operand.vmem [shape: f32[41,64], index: 2, kind: input, shape index: {}]   ;;  %s4245_s3 = inlined_call_operand.vmem [shape: f32[5,64,64], index: 3, kind: input, shape index: {}]   ;;  %s4246_s4 = inlined_call_operand.vmem [shape: f32[4,64,128], index: 4, kind: input, shape index: {}]   ;;  %s4247_s5 = inlined_call_operand.vmem [shape: f32[4,128,64], index: 5, kind: input, shape index: {}]   ;;  %s4248_s6 = inlined_call_operand.vmem [shape: f32[64,32], index: 6, kind: input, shape index: {}]   ;;  %s4249_s7 = inlined_call_operand.vmem [shape: f32[64,6], index: 7, kind: input, shape index: {}]   ;;  %s4250_s8 = inlined_call_operand.vmem [shape: f32[32,6], index: 8, kind: input, shape index: {}]   ;;  %s4251_s9 = inlined_call_operand.vmem [shape: f32[32,6], index: 9, kind: output, shape index: {}]  }
   0x1 LB: > { %s2327_s10 = sadd.s32 4294967295, %s3397_s30   ;;  %p2331_p0 = scmp.ge.s32.totalorder %s3397_s30, 1  ;;  %s3397_s30 = sphi %s3454_s30, %s19_s30  }
   0x2   : > { %p286_p1 = scmp.lt.s32.totalorder %s3397_s30, 5 }
   0x4   : > { %p287_p2 = pnand %p2331_p0, %p286_p1 }
   0x5   : > { %v329_v0 = vld [vmem:[%s4244_s2] sm:$0xff] (!%p287_p2)  ;;  %v330_v1 = vld [vmem:[%s4244_s2 + $0x8] sm:$0xff] (!%p287_p2)  ;;  %v331_v2 = vld [vmem:[%s4244_s2 + $0x10] sm:$0xff] (!%p287_p2)  ;;  %v3399_v3 = vmov (!%p287_p2), 0.0|0.0   ;;  %vm3400_vm0 = vmmov (!%p287_p2), 0   ;;  %v3401_v6 = vmov (!%p287_p2), 0.0  }
   0x6   : > { %290 = sbr.rel (%p287_p2) target bundleno = 7061 (0x1b95), region = 56  ;;  %3076 = vmatprep.subr.bf16.mxu0 (!%p287_p2), %v3399_v3  ;;  %v3077_v4 = vpack.c.bf16 (!%p287_p2), %v330_v1, %v329_v0  ;;  %v332_v5 = vld [vmem:[%s4244_s2 + $0x18] sm:$0xff] (!%p287_p2)  ;;  %3086 = vmatprep.subr.bf16.mxu1 (!%p287_p2), %v3399_v3  ;;  %p320_p3 = scmp.lt.s32.totalorder (!%p287_p2), %s2327_s10, 3  ;;  %v333_v8 = vld [vmem:[%s4244_s2 + $0x20] sm:$0xff] (!%p287_p2)  ;;  %v334_v9 = vld [vmem:[%s4244_s2 + $0x28] sm:$0x1] (!%p287_p2) }
   0x7   : > { %2694 = vmatprep.mubr.msk.f32.mxu0 (!%p287_p2), %vm3400_vm0, %v3401_v6  ;;  %2713 = vmatprep.mubr.msk.f32.mxu1 (!%p287_p2), %vm3400_vm0, %v3401_v6  ;;  %v3080_v7 = vpack.c.bf16 (!%p287_p2), %v332_v5, %v331_v2  ;;  %vm344_vm1 = vcmask (!%p287_p2), 1040384   ;;  %v3083_v10 = vpack.c.bf16 (!%p287_p2), %v334_v9, %v333_v8  ;;  %vm3402_vm2 = vmmov (!%p287_p2), 1   ;;  %v427_v12 = vld [vmem:[%s4245_s3] sm:$0xff] (!%p287_p2)  ;;  %v428_v13 = vld [vmem:[%s4245_s3 + $0x8] sm:$0xff] (!%p287_p2)  ;;  %v429_v14 = vld [vmem:[%s4245_s3 + $0x10] sm:$0xff] (!%p287_p2)  ;;  %s3403_s25 = smov (!%p287_p2), 125  }
   0x8   : > { %3078 = vmatpush3.bf16.msra.mxu0 (!%p287_p2), %v3077_v4  ;;  %vm3084_vm3 = vmpackc.low (!%p287_p2), %vm344_vm1, %vm3402_vm2  ;;  %vm340_vm4 = vcmask (!%p287_p2), 334848   ;;  %v3087_v15 = vpack.c.bf16 (!%p287_p2), %v428_v13, %v427_v12  ;;  %v430_v16 = vld [vmem:[%s4245_s3 + $0x18] sm:$0xff] (!%p287_p2)  ;;  %v431_v18 = vld [vmem:[%s4245_s3 + $0x20] sm:$0xff] (!%p287_p2)  ;;  %vm435_vm5 = vcmask (!%p287_p2), 523264   ;;  %vm2160_vm6 = vcmask (!%p287_p2), 261120  }
   0x9   : > { %3079 = vmatprep.subr.bf16.mxu0 (!%p287_p2), %v3399_v3  ;;  %v3090_v17 = vpack.c.bf16 (!%p287_p2), %v430_v16, %v429_v14  ;;  %v432_v19 = vld [vmem:[%s4245_s3 + $0x28] sm:$0xff] (!%p287_p2)  ;;  %v433_v21 = vld [vmem:[%s4245_s3 + $0x30] sm:$0xff] (!%p287_p2)  ;;  %v434_v22 = vld [vmem:[%s4245_s3 + $0x38] sm:$0xff] (!%p287_p2)  ;;  %vm2046_vm7 = vcmask (!%p287_p2), 48128   ;;  %vm2053_vm8 = vcmask (!%p287_p2), 23552   ;;  %vm2272_vm9 = vcmask (!%p287_p2), 48152  }
   0xa   : > { %3088 = vmatpush3.bf16.msra.mxu1 (!%p287_p2), %v3087_v15  ;;  %v3093_v20 = vpack.c.bf16 (!%p287_p2), %v432_v19, %v431_v18  ;;  %v3096_v23 = vpack.c.bf16 (!%p287_p2), %v434_v22, %v433_v21  ;;  %v2334_v24 = vld [vmem:[%s4243_s1] ss:$0 sm:$0xff] (!%p287_p2)  ;;  %v2342_v42 = vld [vmem:[%s4245_s3 + $0x48] sm:$0xff] (!%p287_p2)  ;;  %v2343_v44 = vld [vmem:[%s4245_s3 + $0x50] sm:$0xff] (!%p287_p2) }
   0xb   : > { %3089 = vmatprep.subr.bf16.mxu1 (!%p287_p2), %v3399_v3  ;;  %v2341_v41 = vld [vmem:[%s4245_s3 + $0x40] sm:$0xff] (!%p287_p2)  ;;  %v2344_v45 = vld [vmem:[%s4245_s3 + $0x58] sm:$0xff] (!%p287_p2)  ;;  %v2346_v48 = vld [vmem:[%s4245_s3 + $0x68] sm:$0xff] (!%p287_p2) }
   0xc   : > { %3081 = vmatpush3.bf16.msra.mxu0 (!%p287_p2), %v3080_v7  ;;  %v3111_v43 = vpack.c.bf16 (!%p287_p2), %v2342_v42, %v2341_v41  ;;  %v3114_v46 = vpack.c.bf16 (!%p287_p2), %v2344_v45, %v2343_v44  ;;  %v2345_v47 = vld [vmem:[%s4245_s3 + $0x60] sm:$0xff] (!%p287_p2)  ;;  %v2347_v50 = vld [vmem:[%s4245_s3 + $0x70] sm:$0xff] (!%p287_p2)  ;;  %v2348_v51 = vld [vmem:[%s4245_s3 + $0x78] sm:$0xff] (!%p287_p2) }
   0xd   : > { %s4253_s10 = smov (!%p320_p3, %s2327_s10), 3  ;;  %3082 = vmatprep.subr.bf16.mxu0 %v3399_v3  ;;  %v3117_v49 = vpack.c.bf16 %v2346_v48, %v2345_v47  ;;  %v3120_v52 = vpack.c.bf16 %v2348_v51, %v2347_v50  ;;  %v2351_v53 = vld [vmem:[%s4245_s3 + $0x80] sm:$0xff]  ;;  %v2352_v54 = vld [vmem:[%s4245_s3 + $0x88] sm:$0xff]  ;;  %v2353_v55 = vld [vmem:[%s4245_s3 + $0x90] sm:$0xff] }
   0xe   : > { %s2332_s23 = sshll.u32 %s4253_s10, 3  ;;  %3091 = vmatpush3.bf16.msra.mxu1 %v3090_v17  ;;  %v3123_v56 = vpack.c.bf16 %v2352_v54, %v2351_v53  ;;  %v2354_v57 = vld [vmem:[%s4245_s3 + $0x98] sm:$0xff]  ;;  %v2355_v59 = vld [vmem:[%s4245_s3 + $0xa0] sm:$0xff]  ;;  %v2356_v60 = vld [vmem:[%s4245_s3 + $0xa8] sm:$0xff] }
   0xf   : > { %s323_s26 = scalar_lea.vmem %s4242_s0, %s2332_s23  ;;  %3092 = vmatprep.subr.bf16.mxu1 %v3399_v3  ;;  %v3126_v58 = vpack.c.bf16 %v2354_v57, %v2353_v55  ;;  %v3129_v61 = vpack.c.bf16 %v2356_v60, %v2355_v59  ;;  %v2339_v2 = vld [vmem:[%s4243_s1 + $0x1] ss:$0 sm:$0xff]  ;;  %v2340_v5 = vld [vmem:[%s4243_s1 + $0x2] ss:$0 sm:$0xff]  ;;  %v2357_v9 = vld [vmem:[%s4245_s3 + $0xb0] sm:$0xff]  ;;  %s327_s24 = scalar_lea.vmem %s4251_s9, %s2332_s23 }
  0x10   : > { %3085 = vmatpush3.bf16.msk.msra.mxu0 %vm3084_vm3, %v3083_v10  ;;  %v328_v11 = vld [vmem:[%s323_s26] sm:$0xff]  ;;  %v2358_v10 = vld [vmem:[%s4245_s3 + $0xb8] sm:$0xff]  ;;  %v2369_v42 = vld [vmem:[%s4245_s3 + $0xe8] sm:$0xff] }
  0x11   : > { %3098 = vmatprep.subr.bf16.mxu0 %v3399_v3  ;;  %v2349_v12 = vld [vmem:[%s4243_s1 + $0x3] ss:$0 sm:$0xff]  ;;  %v2359_v16 = vld [vmem:[%s4243_s1 + $0x4] ss:$0 sm:$0xff]  ;;  %v2370_v44 = vld [vmem:[%s4245_s3 + $0xf0] sm:$0xff] }
  0x12   : > { %3094 = vmatpush3.bf16.msra.mxu1 %v3093_v20  ;;  %v2368_v41 = vld [vmem:[%s4245_s3 + $0xe0] sm:$0xff]  ;;  %v2371_v45 = vld [vmem:[%s4245_s3 + $0xf8] sm:$0xff] }
  0x13   : > { %2695 = vmatmul.mubr.msk.f32.vlgmr.msra.gmra.mrb[0].mxu0 %vm340_vm4, %v328_v11  ;;  %3095 = vmatprep.subr.bf16.mxu1 %v3399_v3  ;;  %v3132_v11 = vpack.c.bf16 %v2358_v10, %v2357_v9  ;;  %v2361_v51 = vld [vmem:[%s4243_s1 + $0x5] ss:$0 sm:$0xff]  ;;  %v2362_v53 = vld [vmem:[%s4243_s1 + $0x6] ss:$0 sm:$0xff]  ;;  %v2363_v55 = vld [vmem:[%s4243_s1 + $0x7] ss:$0 sm:$0xff] }
  0x14   : > { %2732 = vmatprep.mubr.msk.f32.mxu0 %vm3400_vm0, %v3401_v6  ;;  %3100 = vmatpush3.bf16.msra.mxu0 %v3087_v15  ;;  %v928_v10 = vld [vmem:[%s4246_s4 + $0x10] sm:$0xff] }
  0x15   : > { %3101 = vmatprep.subr.bf16.mxu0 %v3399_v3 }
  0x16   : > { %3097 = vmatpush3.bf16.msra.mxu1 %v3096_v23 }
  0x17   : > { %3110 = vmatprep.subr.bf16.mxu1 %v3399_v3 }
  0x18   : > { %3103 = vmatpush3.bf16.msra.mxu0 %v3090_v17 }
  0x19   : > { %3104 = vmatprep.subr.bf16.mxu0 %v3399_v3 }
  0x1c   : > { %3106 = vmatpush3.bf16.msra.mxu0 %v3093_v20 }
  0x1d   : > { %3107 = vmatprep.subr.bf16.mxu0 %v3399_v3 }
  0x20   : > { %3109 = vmatpush3.bf16.msra.mxu0 %v3096_v23 }
  0x21   : > { %3122 = vmatprep.subr.bf16.mxu0 %v3399_v3 }
  0xe6   : > { %v414_v25 = vpop.f32.mrb[0].mxu0 }
  0xe7   : > { %v415_v26 = vadd.f32 %v2334_v24, %v414_v25  ;;  %v2696_v27 = vpop.f32.mrb[1].mxu0 }
  0xe9   : > { %v419_v28 = vmul.f32 0.044715, %v415_v26  ;;  %v418_v34 = vmul.f32 0.5, %v415_v26 }
  0xeb   : > { %v420_v29 = vmul.f32 %v419_v28, %v415_v26 }
  0xed   : > { %v421_v30 = vmul.f32 %v420_v29, %v415_v26 }
  0xef   : > { %v422_v31 = vadd.f32 %v421_v30, %v415_v26 }
  0xf1   : > { %v423_v32 = vmul.f32 0.7978846, %v422_v31 }
  0xf3   : > { %3345 = vtanh.f32 %v423_v32 }
  0xfd   : > { %v3346_v33 = vpop.eup %3345 }
  0xfe   : > { %v425_v35 = vadd.f32 1.0, %v3346_v33 }
 0x100   : > { %v426_v36 = vmul.f32 %v425_v35, %v418_v34  ;;  %v2364_v35 = vld [vmem:[%s4245_s3 + $0xc0] sm:$0xff] }
 0x102   : > { %2714 = vmatmul.mubr.msk.f32.vlgmr.msra.gmra.mrb[0].mxu1 %vm435_vm5, %v426_v36 }
 0x103   : > { %2751 = vmatprep.mubr.msk.f32.mxu1 %vm3400_vm0, %v3401_v6  ;;  %3112 = vmatpush3.bf16.msra.mxu1 %v3111_v43  ;;  %v3141_v43 = vpack.c.bf16 %v2369_v42, %v2368_v41  ;;  %v1030_v41 = vld [vmem:[%s4247_s5 + $0x48] sm:$0xff] }
 0x104   : > { %3113 = vmatprep.subr.bf16.mxu1 %v3399_v3 }
 0x107   : > { %3115 = vmatpush3.bf16.msra.mxu1 %v3114_v46  ;;  %v3144_v46 = vpack.c.bf16 %v2371_v45, %v2370_v44  ;;  %v1032_v44 = vld [vmem:[%s4247_s5 + $0x58] sm:$0xff] }
 0x108   : > { %3116 = vmatprep.subr.bf16.mxu1 %v3399_v3 }
 0x10b   : > { %3118 = vmatpush3.bf16.msra.mxu1 %v3117_v49 }
 0x10c   : > { %3119 = vmatprep.subr.bf16.mxu1 %v3399_v3 }
 0x10f   : > { %3121 = vmatpush3.bf16.msra.mxu1 %v3120_v52 }
 0x110   : > { %3134 = vmatprep.subr.bf16.mxu1 %v3399_v3 }
 0x1d5   : > { %v505_v37 = vpop.f32.mrb[0].mxu1 }
 0x1d6   : > { %v509_v38 = vsub.f32 %v426_v36, %v505_v37  ;;  %v2715_v39 = vpop.f32.mrb[1].mxu1  ;;  %v2365_v36 = vld [vmem:[%s4245_s3 + $0xc8] sm:$0xff] }
 0x1d7   : > { %v3135_v37 = vpack.c.bf16 %v2365_v36, %v2364_v35  ;;  %v2367_v39 = vld [vmem:[%s4245_s3 + $0xd8] sm:$0xff]  ;;  %v1026_v35 = vld [vmem:[%s4247_s5 + $0x28] sm:$0xff] }
 0x1d8   : > { %v510_v40 = vmul.f32 %v509_v38, %v509_v38 }
 0x1da   : > { %2733 = vmatmul.mubr.msk.f32.vlgmr.msra.gmra.mrb[2].mxu0 %vm435_vm5, %v510_v40 }
 0x1db   : > { %2770 = vmatprep.mubr.msk.f32.mxu0 %vm3400_vm0, %v3401_v6  ;;  %3124 = vmatpush3.bf16.msra.mxu0 %v3123_v56 }
 0x1dc   : > { %3125 = vmatprep.subr.bf16.mxu0 %v3399_v3 }
 0x1df   : > { %3127 = vmatpush3.bf16.msra.mxu0 %v3126_v58  ;;  %v2372_v58 = vld [vmem:[%s4243_s1 + $0x8] ss:$0 sm:$0xff] }
 0x1e0   : > { %3128 = vmatprep.subr.bf16.mxu0 %v3399_v3 }
 0x1e3   : > { %3130 = vmatpush3.bf16.msra.mxu0 %v3129_v61 }
 0x1e4   : > { %3131 = vmatprep.subr.bf16.mxu0 %v3399_v3 }
 0x1e7   : > { %3133 = vmatpush3.bf16.msra.mxu0 %v3132_v11  ;;  %v929_v11 = vld [vmem:[%s4246_s4 + $0x18] sm:$0xff] }
 0x1e8   : > { %3146 = vmatprep.subr.bf16.mxu0 %v3399_v3 }
 0x2ad   : > { %v580_v62 = vpop.f32.mrb[2].mxu0 }
 0x2ae   : > { %v581_v63 = vadd.f32 1e-05, %v580_v62  ;;  %v2734_v0 = vpop.f32.mrb[3].mxu0 }
 0x2b0   : > { %3347 = vrsqrt.f32 %v581_v63 }
 0x2ba   : > { %v3348_v1 = vpop.eup %3347 }
 0x2bb   : > { %v585_v4 = vmul.f32 %v3348_v1, %v509_v38  ;;  %v2366_v38 = vld [vmem:[%s4245_s3 + $0xd0] sm:$0xff] }
 0x2bc   : > { %v3138_v40 = vpack.c.bf16 %v2367_v39, %v2366_v38  ;;  %v1028_v38 = vld [vmem:[%s4247_s5 + $0x38] sm:$0xff] }
 0x2bd   : > { %v591_v7 = vmul.f32 %v2339_v2, %v585_v4 }
 0x2bf   : > { %v597_v8 = vadd.f32 %v2340_v5, %v591_v7  ;;  %v926_v7 = vld [vmem:[%s4246_s4] sm:$0xff] }
 0x2c1   : > { %2752 = vmatmul.mubr.msk.f32.vlgmr.msra.gmra.mrb[2].mxu1 %vm435_vm5, %v597_v8  ;;  %v927_v8 = vld [vmem:[%s4246_s4 + $0x8] sm:$0xff] }
 0x2c2   : > { %2789 = vmatprep.mubr.msk.f32.mxu1 %vm3400_vm0, %v3401_v6  ;;  %3136 = vmatpush3.bf16.msra.mxu1 %v3135_v37  ;;  %v3147_v9 = vpack.c.bf16 %v927_v8, %v926_v7  ;;  %v1027_v37 = vld [vmem:[%s4247_s5 + $0x30] sm:$0xff] }
 0x2c3   : > { %3137 = vmatprep.subr.bf16.mxu1 %v3399_v3  ;;  %v3168_v39 = vpack.c.bf16 %v1028_v38, %v1027_v37 }
 0x2c6   : > { %3139 = vmatpush3.bf16.msra.mxu1 %v3138_v40  ;;  %v1029_v40 = vld [vmem:[%s4247_s5 + $0x40] sm:$0xff] }
 0x2c7   : > { %3140 = vmatprep.subr.bf16.mxu1 %v3399_v3  ;;  %v3171_v42 = vpack.c.bf16 %v1030_v41, %v1029_v40 }
 0x2ca   : > { %3142 = vmatpush3.bf16.msra.mxu1 %v3141_v43  ;;  %v1031_v43 = vld [vmem:[%s4247_s5 + $0x50] sm:$0xff] }
 0x2cb   : > { %3143 = vmatprep.subr.bf16.mxu1 %v3399_v3  ;;  %v3174_v45 = vpack.c.bf16 %v1032_v44, %v1031_v43 }
 0x2ce   : > { %3145 = vmatpush3.bf16.msra.mxu1 %v3144_v46  ;;  %v1033_v46 = vld [vmem:[%s4247_s5 + $0x60] sm:$0xff] }
 0x2cf   : > { %3158 = vmatprep.subr.bf16.mxu1 %v3399_v3 }
 0x394   : > { %v681_v13 = vpop.f32.mrb[2].mxu1 }
 0x395   : > { %v682_v14 = vadd.f32 %v2349_v12, %v681_v13  ;;  %v2753_v15 = vpop.f32.mrb[3].mxu1  ;;  %v3150_v12 = vpack.c.bf16 %v929_v11, %v928_v10  ;;  %v930_v13 = vld [vmem:[%s4246_s4 + $0x20] sm:$0xff] }
 0x397   : > { %2771 = vmatmul.mubr.msk.f32.vlgmr.msra.gmra.mrb[4].mxu0 %vm435_vm5, %v682_v14  ;;  %v931_v14 = vld [vmem:[%s4246_s4 + $0x28] sm:$0xff] }
 0x398   : > { %2808 = vmatprep.mubr.msk.f32.mxu0 %vm3400_vm0, %v3401_v6  ;;  %3148 = vmatpush3.bf16.msra.mxu0 %v3147_v9  ;;  %v3153_v15 = vpack.c.bf16 %v931_v14, %v930_v13  ;;  %v2381_v14 = vld [vmem:[%s4246_s4 + $0x80] sm:$0xff] }
 0x399   : > { %3149 = vmatprep.subr.bf16.mxu0 %v3399_v3 }
 0x39c   : > { %3151 = vmatpush3.bf16.msra.mxu0 %v3150_v12 }
 0x39d   : > { %3152 = vmatprep.subr.bf16.mxu0 %v3399_v3 }
 0x3a0   : > { %3154 = vmatpush3.bf16.msra.mxu0 %v3153_v15  ;;  %v2382_v15 = vld [vmem:[%s4246_s4 + $0x88] sm:$0xff] }
 0x3a1   : > { %3155 = vmatprep.subr.bf16.mxu0 %v3399_v3 }
 0x46a   : > { %v768_v17 = vpop.f32.mrb[4].mxu0 }
 0x46b   : > { %v769_v18 = vadd.f32 %v2359_v16, %v768_v17  ;;  %v2772_v19 = vpop.f32.mrb[5].mxu0  ;;  %v932_v16 = vld [vmem:[%s4246_s4 + $0x30] sm:$0xff]  ;;  %v933_v17 = vld [vmem:[%s4246_s4 + $0x38] sm:$0xff] }
 0x46c   : > { %v1021_v19 = vld [vmem:[%s4247_s5] sm:$0xff] }
 0x46d   : > { %v773_v20 = vmul.f32 0.044715, %v769_v18  ;;  %v772_v26 = vmul.f32 0.5, %v769_v18 }
 0x46f   : > { %v774_v21 = vmul.f32 %v773_v20, %v769_v18  ;;  %v1022_v20 = vld [vmem:[%s4247_s5 + $0x8] sm:$0xff] }
 0x471   : > { %v775_v22 = vmul.f32 %v774_v21, %v769_v18  ;;  %v3159_v21 = vpack.c.bf16 %v1022_v20, %v1021_v19  ;;  %v2385_v20 = vld [vmem:[%s4246_s4 + $0xa0] sm:$0xff] }
 0x473   : > { %v776_v23 = vadd.f32 %v775_v22, %v769_v18  ;;  %v3156_v18 = vpack.c.bf16 %v933_v17, %v932_v16  ;;  %v3183_v16 = vpack.c.bf16 %v2382_v15, %v2381_v14  ;;  %v2383_v17 = vld [vmem:[%s4246_s4 + $0x90] sm:$0xff] }
 0x475   : > { %v777_v24 = vmul.f32 0.7978846, %v776_v23  ;;  %3157 = vmatpush3.bf16.msra.mxu0 %v3156_v18  ;;  %v2384_v18 = vld [vmem:[%s4246_s4 + $0x98] sm:$0xff] }
 0x476   : > { %3182 = vmatprep.subr.bf16.mxu0 %v3399_v3  ;;  %v3186_v19 = vpack.c.bf16 %v2384_v18, %v2383_v17  ;;  %v2391_v18 = vld [vmem:[%s4243_s1 + $0x10] ss:$0 sm:$0xff] }
 0x477   : > { %3349 = vtanh.f32 %v777_v24 }
 0x481   : > { %v3350_v25 = vpop.eup %3349 }
 0x482   : > { %v779_v27 = vadd.f32 1.0, %v3350_v25 }
 0x484   : > { %v780_v28 = vmul.f32 %v779_v27, %v772_v26  ;;  %v2374_v26 = vld [vmem:[%s4243_s1 + $0x9] ss:$0 sm:$0xff] }
 0x486   : > { %v781_v29 = vsel %vm435_vm5, %v780_v28, 0.0 }
 0x487   : > { %782 = vadd.xlane.f32.xlu0 %v781_v29 }
 0x514   : > { %v783_v30 = vpop.xlane.xlu0 %782 }
 0x515   : > { %v785_v31 = vmul.f32 0.015625, %v783_v30 }
 0x517   : > { %v786_v32 = vsub.f32 %v780_v28, %v785_v31  ;;  %v2375_v28 = vld [vmem:[%s4243_s1 + $0xa] ss:$0 sm:$0xff]  ;;  %v1023_v31 = vld [vmem:[%s4247_s5 + $0x10] sm:$0xff] }
 0x519   : > { %v787_v33 = vmul.f32 %v786_v32, %v786_v32 }
 0x51b   : > { %v788_v34 = vsel %vm435_vm5, %v787_v33, 0.0 }
 0x51c   : > { %789 = vadd.xlane.f32.xlu0 %v788_v34  ;;  %v1025_v34 = vld [vmem:[%s4247_s5 + $0x20] sm:$0xff] }
 0x51d   : > { %v3165_v36 = vpack.c.bf16 %v1026_v35, %v1025_v34  ;;  %v2389_v35 = vld [vmem:[%s4243_s1 + $0xf] ss:$0 sm:$0xff] }
 0x5a9   : > { %v790_v47 = vpop.xlane.xlu0 %789 }
 0x5aa   : > { %v791_v48 = vmul.f32 0.015625, %v790_v47  ;;  %v1034_v47 = vld [vmem:[%s4247_s5 + $0x68] sm:$0xff] }
 0x5ac   : > { %v792_v49 = vadd.f32 1e-05, %v791_v48  ;;  %v3177_v48 = vpack.c.bf16 %v1034_v47, %v1033_v46 }
 0x5ae   : > { %3351 = vrsqrt.f32 %v792_v49  ;;  %v1035_v49 = vld [vmem:[%s4247_s5 + $0x70] sm:$0xff] }
 0x5b8   : > { %v3352_v50 = vpop.eup %3351 }
 0x5b9   : > { %v794_v52 = vmul.f32 %v3352_v50, %v786_v32  ;;  %v1024_v32 = vld [vmem:[%s4247_s5 + $0x18] sm:$0xff] }
 0x5ba   : > { %v3162_v33 = vpack.c.bf16 %v1024_v32, %v1023_v31  ;;  %v1036_v50 = vld [vmem:[%s4247_s5 + $0x78] sm:$0xff]  ;;  %v2380_v32 = vld [vmem:[%s4243_s1 + $0xe] ss:$0 sm:$0xff] }
 0x5bb   : > { %v800_v54 = vmul.f32 %v2361_v51, %v794_v52  ;;  %v3180_v51 = vpack.c.bf16 %v1036_v50, %v1035_v49  ;;  %v2376_v52 = vld [vmem:[%s4243_s1 + $0xb] ss:$0 sm:$0xff]  ;;  %v2395_v50 = vld [vmem:[%s4247_s5 + $0x110] sm:$0xff] }
 0x5bc   : > { %v2394_v49 = vld [vmem:[%s4247_s5 + $0x108] sm:$0xff] }
 0x5bd   : > { %v806_v56 = vadd.f32 %v2362_v53, %v800_v54 }
 0x5bf   : > { %v812_v57 = vadd.f32 %v2363_v55, %v806_v56 }
 0x5c1   : > { %2790 = vmatmul.mubr.msk.f32.vlgmr.msra.gmra.mrb[4].mxu1 %vm435_vm5, %v812_v57 }
 0x5c2   : > { %2843 = vmatprep.mubr.msk.f32.mxu1 %vm3400_vm0, %v3401_v6  ;;  %3160 = vmatpush3.bf16.msra.mxu1 %v3159_v21  ;;  %v2386_v21 = vld [vmem:[%s4246_s4 + $0xa8] sm:$0xff] }
 0x5c3   : > { %3161 = vmatprep.subr.bf16.mxu1 %v3399_v3 }
 0x5c6   : > { %3163 = vmatpush3.bf16.msra.mxu1 %v3162_v33 }
 0x5c7   : > { %3164 = vmatprep.subr.bf16.mxu1 %v3399_v3 }
 0x5ca   : > { %3166 = vmatpush3.bf16.msra.mxu1 %v3165_v36 }
 0x5cb   : > { %3167 = vmatprep.subr.bf16.mxu1 %v3399_v3 }
 0x5ce   : > { %3169 = vmatpush3.bf16.msra.mxu1 %v3168_v39 }
 0x5cf   : > { %3170 = vmatprep.subr.bf16.mxu1 %v3399_v3 }
 0x5d2   : > { %3172 = vmatpush3.bf16.msra.mxu1 %v3171_v42 }
 0x5d3   : > { %3173 = vmatprep.subr.bf16.mxu1 %v3399_v3 }
 0x5d6   : > { %3175 = vmatpush3.bf16.msra.mxu1 %v3174_v45 }
 0x5d7   : > { %3176 = vmatprep.subr.bf16.mxu1 %v3399_v3 }
 0x5da   : > { %3178 = vmatpush3.bf16.msra.mxu1 %v3177_v48  ;;  %v2393_v48 = vld [vmem:[%s4247_s5 + $0x100] sm:$0xff] }
 0x5db   : > { %3179 = vmatprep.subr.bf16.mxu1 %v3399_v3 }
 0x5de   : > { %3181 = vmatpush3.bf16.msra.mxu1 %v3180_v51  ;;  %v3195_v51 = vpack.c.bf16 %v2394_v49, %v2393_v48  ;;  %v2416_v49 = vld [vmem:[%s4245_s3 + $0x120] sm:$0xff] }
 0x5df   : > { %3218 = vmatprep.subr.bf16.mxu1 %v3399_v3 }
 0x694   : > { %v896_v59 = vpop.f32.mrb[4].mxu1 }
 0x695   : > { %v897_v60 = vadd.f32 %v2372_v58, %v896_v59  ;;  %v2791_v61 = vpop.f32.mrb[5].mxu1 }
 0x697   : > { %v900_v62 = vadd.f32 %v897_v60, %v812_v57 }
 0x699   : > { %v901_v63 = vsel %vm435_vm5, %v900_v62, 0.0 }
 0x69a   : > { %902 = vadd.xlane.f32.xlu1 %v901_v63 }
 0x727   : > { %v903_v0 = vpop.xlane.xlu1 %902 }
 0x728   : > { %v904_v1 = vmul.f32 0.015625, %v903_v0 }
 0x72a   : > { %v905_v2 = vsub.f32 %v900_v62, %v904_v1 }
 0x72c   : > { %v906_v4 = vmul.f32 %v905_v2, %v905_v2 }
 0x72e   : > { %v907_v5 = vsel %vm435_vm5, %v906_v4, 0.0 }
 0x72f   : > { %908 = vadd.xlane.f32.xlu1 %v907_v5 }
 0x7bc   : > { %v909_v22 = vpop.xlane.xlu1 %908 }
 0x7bd   : > { %v910_v23 = vmul.f32 0.015625, %v909_v22  ;;  %v3189_v22 = vpack.c.bf16 %v2386_v21, %v2385_v20  ;;  %v2392_v20 = vld [vmem:[%s4243_s1 + $0x11] ss:$0 sm:$0xff] }
 0x7bf   : > { %v911_v24 = vadd.f32 1e-05, %v910_v23  ;;  %v2387_v23 = vld [vmem:[%s4246_s4 + $0xb0] sm:$0xff] }
 0x7c1   : > { %3353 = vrsqrt.f32 %v911_v24  ;;  %v2388_v24 = vld [vmem:[%s4246_s4 + $0xb8] sm:$0xff] }
 0x7cb   : > { %v3354_v25 = vpop.eup %3353 }
 0x7cc   : > { %v913_v27 = vmul.f32 %v3354_v25, %v905_v2  ;;  %v2378_v2 = vld [vmem:[%s4243_s1 + $0xc] ss:$0 sm:$0xff]  ;;  %v3192_v25 = vpack.c.bf16 %v2388_v24, %v2387_v23  ;;  %v2409_v23 = vld [vmem:[%s4243_s1 + $0x12] ss:$0 sm:$0xff] }
 0x7ce   : > { %v919_v29 = vmul.f32 %v2374_v26, %v913_v27 }
 0x7d0   : > { %v925_v30 = vadd.f32 %v2375_v28, %v919_v29 }
 0x7d2   : > { %2809 = vmatmul.mubr.msk.f32.vlgmr.msra.gmra.mrb[6].mxu0 %vm435_vm5, %v925_v30 }
 0x7d3   : > { %2862 = vmatprep.mubr.msk.f32.mxu0 %vm3400_vm0, %v3401_v6  ;;  %3184 = vmatpush3.bf16.msra.mxu0 %v3183_v16 }
 0x7d4   : > { %3185 = vmatprep.subr.bf16.mxu0 %v3399_v3 }
 0x7d7   : > { %3187 = vmatpush3.bf16.msra.mxu0 %v3186_v19 }
 0x7d8   : > { %3188 = vmatprep.subr.bf16.mxu0 %v3399_v3 }
 0x7db   : > { %3190 = vmatpush3.bf16.msra.mxu0 %v3189_v22 }
 0x7dc   : > { %3191 = vmatprep.subr.bf16.mxu0 %v3399_v3 }
 0x7df   : > { %3193 = vmatpush3.bf16.msra.mxu0 %v3192_v25 }
 0x7e0   : > { %3194 = vmatprep.subr.bf16.mxu0 %v3399_v3 }
 0x8a5   : > { %v1008_v53 = vpop.f32.mrb[6].mxu0 }
 0x8a6   : > { %v1009_v54 = vadd.f32 %v2376_v52, %v1008_v53  ;;  %v2810_v55 = vpop.f32.mrb[7].mxu0  ;;  %v2396_v52 = vld [vmem:[%s4247_s5 + $0x118] sm:$0xff] }
 0x8a7   : > { %v3198_v53 = vpack.c.bf16 %v2396_v52, %v2395_v50  ;;  %v2398_v55 = vld [vmem:[%s4247_s5 + $0x128] sm:$0xff]  ;;  %v2418_v52 = vld [vmem:[%s4245_s3 + $0x130] sm:$0xff] }
 0x8a8   : > { %v1013_v56 = vmul.f32 0.044715, %v1009_v54  ;;  %v1012_v62 = vmul.f32 0.5, %v1009_v54  ;;  %v2417_v50 = vld [vmem:[%s4245_s3 + $0x128] sm:$0xff] }
 0x8aa   : > { %v1014_v57 = vmul.f32 %v1013_v56, %v1009_v54 }
 0x8ac   : > { %v1015_v58 = vmul.f32 %v1014_v57, %v1009_v54 }
 0x8ae   : > { %v1016_v59 = vadd.f32 %v1015_v58, %v1009_v54  ;;  %v2397_v54 = vld [vmem:[%s4247_s5 + $0x120] sm:$0xff] }
 0x8af   : > { %v3201_v56 = vpack.c.bf16 %v2398_v55, %v2397_v54 }
 0x8b0   : > { %v1017_v60 = vmul.f32 0.7978846, %v1016_v59 }
 0x8b2   : > { %3355 = vtanh.f32 %v1017_v60 }
 0x8bc   : > { %v3356_v61 = vpop.eup %3355 }
 0x8bd   : > { %v1019_v63 = vadd.f32 1.0, %v3356_v61  ;;  %v2399_v61 = vld [vmem:[%s4247_s5 + $0x130] sm:$0xff] }
 0x8bf   : > { %v1020_v0 = vmul.f32 %v1019_v63, %v1012_v62  ;;  %v2400_v62 = vld [vmem:[%s4247_s5 + $0x138] sm:$0xff] }
 0x8c0   : > { %v3204_v63 = vpack.c.bf16 %v2400_v62, %v2399_v61  ;;  %v2411_v61 = vld [vmem:[%s4243_s1 + $0x14] ss:$0 sm:$0xff] }
 0x8c1   : > { %2844 = vmatmul.mubr.f32.vlgmr.msra.gmra.mrb[6].mxu1 %v1020_v0  ;;  %v2401_v0 = vld [vmem:[%s4247_s5 + $0x140] sm:$0xff] }
 0x8c2   : > { %2916 = vmatprep.mubr.msk.f32.mxu1 %vm3400_vm0, %v3401_v6 }
 0x994   : > { %v1103_v1 = vpop.f32.mrb[6].mxu1 }
 0x995   : > { %v1107_v4 = vadd.f32 %v1103_v1, %v925_v30  ;;  %v2845_v5 = vpop.f32.mrb[7].mxu1  ;;  %v2379_v30 = vld [vmem:[%s4243_s1 + $0xd] ss:$0 sm:$0xff] }
 0x996   : > { %v2402_v1 = vld [vmem:[%s4247_s5 + $0x148] sm:$0xff]  ;;  %v2404_v5 = vld [vmem:[%s4247_s5 + $0x158] sm:$0xff] }
 0x997   : > { %v1113_v7 = vadd.f32 %v2378_v2, %v1107_v4  ;;  %v3207_v2 = vpack.c.bf16 %v2402_v1, %v2401_v0  ;;  %v2403_v4 = vld [vmem:[%s4247_s5 + $0x150] sm:$0xff] }
 0x998   : > { %v2420_v1 = vld [vmem:[%s4243_s1 + $0x15] ss:$0 sm:$0xff] }
 0x999   : > { %v1114_v8 = vsel %vm435_vm5, %v1113_v7, 0.0 }
 0x99a   : > { %1115 = vadd.xlane.f32.xlu0 %v1114_v8  ;;  %v2405_v8 = vld [vmem:[%s4247_s5 + $0x160] sm:$0xff] }
 0xa27   : > { %v1116_v9 = vpop.xlane.xlu0 %1115 }
 0xa28   : > { %v1117_v10 = vmul.f32 0.015625, %v1116_v9  ;;  %v2406_v9 = vld [vmem:[%s4247_s5 + $0x168] sm:$0xff] }
 0xa2a   : > { %v1118_v11 = vsub.f32 %v1113_v7, %v1117_v10  ;;  %v3210_v7 = vpack.c.bf16 %v2404_v5, %v2403_v4  ;;  %v3213_v10 = vpack.c.bf16 %v2406_v9, %v2405_v8 }
 0xa2c   : > { %v1119_v12 = vmul.f32 %v1118_v11, %v1118_v11 }
 0xa2e   : > { %v1120_v13 = vsel %vm435_vm5, %v1119_v12, 0.0  ;;  %v2408_v12 = vld [vmem:[%s4247_s5 + $0x178] sm:$0xff] }
 0xa2f   : > { %1121 = vadd.xlane.f32.xlu1 %v1120_v13 }
 0xabc   : > { %v1122_v26 = vpop.xlane.xlu1 %1121 }
 0xabd   : > { %v1123_v27 = vmul.f32 0.015625, %v1122_v26 }
 0xabf   : > { %v1124_v28 = vadd.f32 1e-05, %v1123_v27 }
 0xac1   : > { %3357 = vrsqrt.f32 %v1124_v28 }
 0xacb   : > { %v3358_v29 = vpop.eup %3357 }
 0xacc   : > { %v1126_v31 = vmul.f32 %v3358_v29, %v1118_v11  ;;  %v2407_v11 = vld [vmem:[%s4247_s5 + $0x170] sm:$0xff] }
 0xacd   : > { %v3216_v13 = vpack.c.bf16 %v2408_v12, %v2407_v11 }
 0xace   : > { %v1132_v33 = vmul.f32 %v2379_v30, %v1126_v31 }
 0xad0   : > { %v3798_v34 = vadd.f32 %v2380_v32, %v1132_v33 }
 0xad2   : > { %2863 = vmatmul.mubr.msk.f32.vlgmr.msra.gmra.mrb[8].mxu0 %vm435_vm5, %v3798_v34 }
 0xad3   : > { %2897 = vmatprep.mubr.msk.f32.mxu0 %vm3400_vm0, %v3401_v6  ;;  %3196 = vmatpush3.bf16.msra.mxu0 %v3195_v51  ;;  %v3225_v51 = vpack.c.bf16 %v2417_v50, %v2416_v49  ;;  %v2444_v50 = vld [vmem:[%s4247_s5 + $0xd0] sm:$0xff] }
 0xad4   : > { %3197 = vmatprep.subr.bf16.mxu0 %v3399_v3 }
 0xad7   : > { %3199 = vmatpush3.bf16.msra.mxu0 %v3198_v53  ;;  %v2419_v53 = vld [vmem:[%s4245_s3 + $0x138] sm:$0xff] }
 0xad8   : > { %3200 = vmatprep.subr.bf16.mxu0 %v3399_v3  ;;  %v3228_v54 = vpack.c.bf16 %v2419_v53, %v2418_v52  ;;  %v2446_v53 = vld [vmem:[%s4247_s5 + $0xe0] sm:$0xff] }
 0xadb   : > { %3202 = vmatpush3.bf16.msra.mxu0 %v3201_v56 }
 0xadc   : > { %3203 = vmatprep.subr.bf16.mxu0 %v3399_v3 }
 0xadf   : > { %3205 = vmatpush3.bf16.msra.mxu0 %v3204_v63 }
 0xae0   : > { %3206 = vmatprep.subr.bf16.mxu0 %v3399_v3 }
 0xae3   : > { %3208 = vmatpush3.bf16.msra.mxu0 %v3207_v2 }
 0xae4   : > { %3209 = vmatprep.subr.bf16.mxu0 %v3399_v3 }
 0xae7   : > { %3211 = vmatpush3.bf16.msra.mxu0 %v3210_v7 }
 0xae8   : > { %3212 = vmatprep.subr.bf16.mxu0 %v3399_v3 }
 0xaeb   : > { %3214 = vmatpush3.bf16.msra.mxu0 %v3213_v10 }
 0xaec   : > { %3215 = vmatprep.subr.bf16.mxu0 %v3399_v3 }
 0xaef   : > { %3217 = vmatpush3.bf16.msra.mxu0 %v3216_v13  ;;  %v2424_v13 = vld [vmem:[%s4246_s4 + $0x40] sm:$0xff] }
 0xaf0   : > { %3242 = vmatprep.subr.bf16.mxu0 %v3399_v3 }
 0xba5   : > { %v1222_v36 = vpop.f32.mrb[8].mxu0 }
 0xba6   : > { %v1223_v37 = vadd.f32 %v2389_v35, %v1222_v36  ;;  %v2864_v38 = vpop.f32.mrb[9].mxu0 }
 0xba8   : > { %v1227_v39 = vmul.f32 0.044715, %v1223_v37  ;;  %v1226_v45 = vmul.f32 0.5, %v1223_v37 }
 0xbaa   : > { %v1228_v40 = vmul.f32 %v1227_v39, %v1223_v37 }
 0xbac   : > { %v1229_v41 = vmul.f32 %v1228_v40, %v1223_v37 }
 0xbae   : > { %v1230_v42 = vadd.f32 %v1229_v41, %v1223_v37 }
 0xbb0   : > { %v1231_v43 = vmul.f32 0.7978846, %v1230_v42 }
 0xbb2   : > { %3359 = vtanh.f32 %v1231_v43  ;;  %v2412_v43 = vld [vmem:[%s4245_s3 + $0x100] sm:$0xff] }
 0xbbc   : > { %v3360_v44 = vpop.eup %3359 }
 0xbbd   : > { %v1233_v46 = vadd.f32 1.0, %v3360_v44  ;;  %v2413_v44 = vld [vmem:[%s4245_s3 + $0x108] sm:$0xff] }
 0xbbf   : > { %v1234_v47 = vmul.f32 %v1233_v46, %v1226_v45  ;;  %v3219_v45 = vpack.c.bf16 %v2413_v44, %v2412_v43  ;;  %v2414_v46 = vld [vmem:[%s4245_s3 + $0x110] sm:$0xff] }
 0xbc0   : > { %v2440_v44 = vld [vmem:[%s4247_s5 + $0xb0] sm:$0xff] }
 0xbc1   : > { %1235 = vadd.xlane.f32.xlu0 %v1234_v47  ;;  %3220 = vmatpush3.bf16.msra.mxu1 %v3219_v45  ;;  %v2441_v45 = vld [vmem:[%s4247_s5 + $0xb8] sm:$0xff] }
 0xbc2   : > { %3221 = vmatprep.subr.bf16.mxu1 %v3399_v3 }
 0xc4e   : > { %v1236_v57 = vpop.xlane.xlu0 %1235 }
 0xc4f   : > { %v1238_v58 = vmul.f32 0.0078125, %v1236_v57 }
 0xc51   : > { %v1239_v59 = vsub.f32 %v1234_v47, %v1238_v58  ;;  %v2415_v47 = vld [vmem:[%s4245_s3 + $0x118] sm:$0xff] }
 0xc52   : > { %v3222_v48 = vpack.c.bf16 %v2415_v47, %v2414_v46  ;;  %v3252_v46 = vpack.c.bf16 %v2441_v45, %v2440_v44  ;;  %v2442_v47 = vld [vmem:[%s4247_s5 + $0xc0] sm:$0xff] }
 0xc53   : > { %v1240_v60 = vmul.f32 %v1239_v59, %v1239_v59 }
 0xc54   : > { %3223 = vmatpush3.bf16.msra.mxu1 %v3222_v48  ;;  %v2443_v48 = vld [vmem:[%s4247_s5 + $0xc8] sm:$0xff] }
 0xc55   : > { %1241 = vadd.xlane.f32.xlu1 %v1240_v60  ;;  %3224 = vmatprep.subr.bf16.mxu1 %v3399_v3  ;;  %v3255_v49 = vpack.c.bf16 %v2443_v48, %v2442_v47 }
 0xc58   : > { %3226 = vmatpush3.bf16.msra.mxu1 %v3225_v51  ;;  %v2445_v51 = vld [vmem:[%s4247_s5 + $0xd8] sm:$0xff] }
 0xc59   : > { %3227 = vmatprep.subr.bf16.mxu1 %v3399_v3  ;;  %v3258_v52 = vpack.c.bf16 %v2445_v51, %v2444_v50 }
 0xc5c   : > { %3229 = vmatpush3.bf16.msra.mxu1 %v3228_v54  ;;  %v2447_v54 = vld [vmem:[%s4247_s5 + $0xe8] sm:$0xff] }
 0xc5d   : > { %3230 = vmatprep.subr.bf16.mxu1 %v3399_v3 }
 0xce2   : > { %v1242_v14 = vpop.xlane.xlu1 %1241 }
 0xce3   : > { %v1243_v15 = vmul.f32 0.0078125, %v1242_v14  ;;  %v2425_v14 = vld [vmem:[%s4246_s4 + $0x48] sm:$0xff] }
 0xce5   : > { %v1244_v16 = vadd.f32 1e-05, %v1243_v15  ;;  %v3231_v15 = vpack.c.bf16 %v2425_v14, %v2424_v13 }
 0xce7   : > { %3361 = vrsqrt.f32 %v1244_v16  ;;  %v2426_v16 = vld [vmem:[%s4246_s4 + $0x50] sm:$0xff] }
 0xcf1   : > { %v3362_v17 = vpop.eup %3361 }
 0xcf2   : > { %v1246_v19 = vmul.f32 %v3362_v17, %v1239_v59  ;;  %v2410_v59 = vld [vmem:[%s4243_s1 + $0x13] ss:$0 sm:$0xff]  ;;  %v2427_v17 = vld [vmem:[%s4246_s4 + $0x58] sm:$0xff] }
 0xcf4   : > { %v1252_v21 = vmul.f32 %v2391_v18, %v1246_v19  ;;  %v3234_v18 = vpack.c.bf16 %v2427_v17, %v2426_v16  ;;  %v2428_v19 = vld [vmem:[%s4246_s4 + $0x60] sm:$0xff] }
 0xcf6   : > { %v1258_v22 = vadd.f32 %v2392_v20, %v1252_v21  ;;  %v2429_v20 = vld [vmem:[%s4246_s4 + $0x68] sm:$0xff] }
 0xcf7   : > { %v3237_v21 = vpack.c.bf16 %v2429_v20, %v2428_v19  ;;  %v2453_v20 = vld [vmem:[%s4246_s4 + $0xc0] sm:$0xff] }
 0xcf8   : > { %2898 = vmatmul.mubr.f32.vlgmr.msra.gmra.mrb[10].mxu0 %v1258_v22  ;;  %v2430_v22 = vld [vmem:[%s4246_s4 + $0x70] sm:$0xff] }
 0xcf9   : > { %2970 = vmatprep.mubr.msk.f32.mxu0 %vm3400_vm0, %v3401_v6 }
 0xdcb   : > { %v1347_v24 = vpop.f32.mrb[10].mxu0 }
 0xdcc   : > { %v1348_v25 = vadd.f32 %v2409_v23, %v1347_v24  ;;  %v2899_v26 = vpop.f32.mrb[11].mxu0  ;;  %v2431_v23 = vld [vmem:[%s4246_s4 + $0x78] sm:$0xff] }
 0xdcd   : > { %v3240_v24 = vpack.c.bf16 %v2431_v23, %v2430_v22  ;;  %v2435_v26 = vld [vmem:[%s4247_s5 + $0x88] sm:$0xff]  ;;  %v2455_v23 = vld [vmem:[%s4246_s4 + $0xd0] sm:$0xff] }
 0xdce   : > { %v1352_v27 = vmul.f32 0.044715, %v1348_v25  ;;  %v1351_v33 = vmul.f32 0.5, %v1348_v25 }
 0xdd0   : > { %v1353_v28 = vmul.f32 %v1352_v27, %v1348_v25 }
 0xdd2   : > { %v1354_v29 = vmul.f32 %v1353_v28, %v1348_v25 }
 0xdd4   : > { %v1355_v30 = vadd.f32 %v1354_v29, %v1348_v25  ;;  %v2434_v25 = vld [vmem:[%s4247_s5 + $0x80] sm:$0xff] }
 0xdd5   : > { %v3243_v27 = vpack.c.bf16 %v2435_v26, %v2434_v25  ;;  %v2457_v26 = vld [vmem:[%s4246_s4 + $0xe0] sm:$0xff] }
 0xdd6   : > { %v1356_v31 = vmul.f32 0.7978846, %v1355_v30 }
 0xdd7   : > { %3244 = vmatpush3.bf16.msra.mxu0 %v3243_v27  ;;  %v2458_v27 = vld [vmem:[%s4246_s4 + $0xe8] sm:$0xff] }
 0xdd8   : > { %3363 = vtanh.f32 %v1356_v31  ;;  %3245 = vmatprep.subr.bf16.mxu0 %v3399_v3 }
 0xde2   : > { %v3364_v32 = vpop.eup %3363 }
 0xde3   : > { %v1358_v35 = vadd.f32 1.0, %v3364_v32  ;;  %v2422_v32 = vld [vmem:[%s4243_s1 + $0x16] ss:$0 sm:$0xff] }
 0xde5   : > { %v1359_v36 = vmul.f32 %v1358_v35, %v1351_v33  ;;  %v2423_v35 = vld [vmem:[%s4243_s1 + $0x17] ss:$0 sm:$0xff] }
 0xde7   : > { %v1360_v37 = vsel %vm435_vm5, %v1359_v36, 0.0 }
 0xde8   : > { %1361 = vadd.xlane.f32.xlu0 %v1360_v37 }
 0xe75   : > { %v1362_v38 = vpop.xlane.xlu0 %1361 }
 0xe76   : > { %v1363_v39 = vmul.f32 0.015625, %v1362_v38  ;;  %v2436_v38 = vld [vmem:[%s4247_s5 + $0x90] sm:$0xff] }
 0xe78   : > { %v1364_v40 = vsub.f32 %v1359_v36, %v1363_v39  ;;  %v2437_v39 = vld [vmem:[%s4247_s5 + $0x98] sm:$0xff] }
 0xe7a   : > { %v1365_v41 = vmul.f32 %v1364_v40, %v1364_v40 }
 0xe7c   : > { %v1366_v42 = vsel %vm435_vm5, %v1365_v41, 0.0  ;;  %v2438_v41 = vld [vmem:[%s4247_s5 + $0xa0] sm:$0xff] }
 0xe7d   : > { %1367 = vadd.xlane.f32.xlu1 %v1366_v42  ;;  %v2439_v42 = vld [vmem:[%s4247_s5 + $0xa8] sm:$0xff] }
 0xe7e   : > { %v3249_v43 = vpack.c.bf16 %v2439_v42, %v2438_v41  ;;  %v2461_v42 = vld [vmem:[%s4243_s1 + $0x1c] ss:$0 sm:$0xff] }
 0xf0a   : > { %v1368_v55 = vpop.xlane.xlu1 %1367 }
 0xf0b   : > { %v1369_v56 = vmul.f32 0.015625, %v1368_v55  ;;  %v3261_v55 = vpack.c.bf16 %v2447_v54, %v2446_v53 }
 0xf0d   : > { %v1370_v57 = vadd.f32 1e-05, %v1369_v56  ;;  %v2448_v56 = vld [vmem:[%s4247_s5 + $0xf0] sm:$0xff] }
 0xf0f   : > { %3365 = vrsqrt.f32 %v1370_v57  ;;  %v2449_v57 = vld [vmem:[%s4247_s5 + $0xf8] sm:$0xff] }
 0xf19   : > { %v3366_v58 = vpop.eup %3365 }
 0xf1a   : > { %v1372_v60 = vmul.f32 %v3366_v58, %v1364_v40  ;;  %v3246_v40 = vpack.c.bf16 %v2437_v39, %v2436_v38  ;;  %v3264_v58 = vpack.c.bf16 %v2449_v57, %v2448_v56  ;;  %v2452_v39 = vld [vmem:[%s4243_s1 + $0x1b] ss:$0 sm:$0xff]  ;;  %v2466_v56 = vld [vmem:[%s4247_s5 + $0x188] sm:$0xff]  ;;  %v2467_v57 = vld [vmem:[%s4247_s5 + $0x190] sm:$0xff] }
 0xf1c   : > { %v1378_v62 = vmul.f32 %v2410_v59, %v1372_v60  ;;  %3247 = vmatpush3.bf16.msra.mxu0 %v3246_v40  ;;  %v2432_v59 = vld [vmem:[%s4243_s1 + $0x18] ss:$0 sm:$0xff] }
 0xf1d   : > { %3248 = vmatprep.subr.bf16.mxu0 %v3399_v3 }
 0xf1e   : > { %v1384_v63 = vadd.f32 %v2411_v61, %v1378_v62 }
 0xf20   : > { %v1385_v0 = vadd.f32 %v1384_v63, %v3798_v34  ;;  %3250 = vmatpush3.bf16.msra.mxu0 %v3249_v43 }
 0xf21   : > { %3251 = vmatprep.subr.bf16.mxu0 %v3399_v3 }
 0xf22   : > { %2917 = vmatmul.mubr.msk.f32.vlgmr.msra.gmra.mrb[8].mxu1 %vm435_vm5, %v1385_v0 }
 0xf23   : > { %2935 = vmatprep.mubr.msk.f32.mxu1 %vm3400_vm0, %v3401_v6  ;;  %3232 = vmatpush3.bf16.msra.mxu1 %v3231_v15 }
 0xf24   : > { %3233 = vmatprep.subr.bf16.mxu1 %v3399_v3  ;;  %3253 = vmatpush3.bf16.msra.mxu0 %v3252_v46 }
 0xf25   : > { %3254 = vmatprep.subr.bf16.mxu0 %v3399_v3 }
 0xf27   : > { %3235 = vmatpush3.bf16.msra.mxu1 %v3234_v18 }
 0xf28   : > { %3236 = vmatprep.subr.bf16.mxu1 %v3399_v3  ;;  %3256 = vmatpush3.bf16.msra.mxu0 %v3255_v49 }
 0xf29   : > { %3257 = vmatprep.subr.bf16.mxu0 %v3399_v3 }
 0xf2b   : > { %3238 = vmatpush3.bf16.msra.mxu1 %v3237_v21  ;;  %v2454_v21 = vld [vmem:[%s4246_s4 + $0xc8] sm:$0xff] }
 0xf2c   : > { %3239 = vmatprep.subr.bf16.mxu1 %v3399_v3  ;;  %3259 = vmatpush3.bf16.msra.mxu0 %v3258_v52  ;;  %v3267_v22 = vpack.c.bf16 %v2454_v21, %v2453_v20 }
 0xf2d   : > { %3260 = vmatprep.subr.bf16.mxu0 %v3399_v3 }
 0xf2f   : > { %3241 = vmatpush3.bf16.msra.mxu1 %v3240_v24  ;;  %v2456_v24 = vld [vmem:[%s4246_s4 + $0xd8] sm:$0xff] }
 0xf30   : > { %3266 = vmatprep.subr.bf16.mxu1 %v3399_v3  ;;  %3262 = vmatpush3.bf16.msra.mxu0 %v3261_v55  ;;  %v3270_v25 = vpack.c.bf16 %v2456_v24, %v2455_v23  ;;  %v2465_v55 = vld [vmem:[%s4247_s5 + $0x180] sm:$0xff]  ;;  %v2463_v24 = vld [vmem:[%s4243_s1 + $0x1d] ss:$0 sm:$0xff] }
 0xf31   : > { %3263 = vmatprep.subr.bf16.mxu0 %v3399_v3 }
 0xf34   : > { %3265 = vmatpush3.bf16.msra.mxu0 %v3264_v58  ;;  %v3279_v58 = vpack.c.bf16 %v2466_v56, %v2465_v55  ;;  %v1964_v56 = vld [vmem:[%s4249_s7 + $0x20] sm:$0xff] }
 0xf35   : > { %3302 = vmatprep.subr.bf16.mxu0 %v3399_v3 }
 0xff5   : > { %v1469_v2 = vpop.f32.mrb[8].mxu1 }
 0xff6   : > { %v1470_v4 = vadd.f32 %v2420_v1, %v1469_v2  ;;  %v2918_v5 = vpop.f32.mrb[9].mxu1 }
 0xff8   : > { %v1473_v7 = vadd.f32 %v1470_v4, %v1385_v0 }
 0xffa   : > { %v1474_v8 = vsel %vm435_vm5, %v1473_v7, 0.0 }
 0xffb   : > { %1475 = vadd.xlane.f32.xlu0 %v1474_v8 }
0x1088   : > { %v1476_v9 = vpop.xlane.xlu0 %1475 }
0x1089   : > { %v1477_v10 = vmul.f32 0.015625, %v1476_v9 }
0x108b   : > { %v1478_v11 = vsub.f32 %v1473_v7, %v1477_v10 }
0x108d   : > { %v1479_v34 = vmul.f32 %v1478_v11, %v1478_v11 }
0x108f   : > { %v1480_v12 = vsel %vm435_vm5, %v1479_v34, 0.0 }
0x1090   : > { %1481 = vadd.xlane.f32.xlu1 %v1480_v12 }
0x111d   : > { %v1482_v28 = vpop.xlane.xlu1 %1481 }
0x111e   : > { %v1483_v29 = vmul.f32 0.015625, %v1482_v28  ;;  %v3273_v28 = vpack.c.bf16 %v2458_v27, %v2457_v26  ;;  %v2464_v26 = vld [vmem:[%s4243_s1 + $0x1e] ss:$0 sm:$0xff] }
0x1120   : > { %v1484_v30 = vadd.f32 1e-05, %v1483_v29  ;;  %v2459_v29 = vld [vmem:[%s4246_s4 + $0xf0] sm:$0xff] }
0x1122   : > { %3367 = vrsqrt.f32 %v1484_v30  ;;  %v2460_v30 = vld [vmem:[%s4246_s4 + $0xf8] sm:$0xff] }
0x112c   : > { %v3368_v31 = vpop.eup %3367 }
0x112d   : > { %v1486_v33 = vmul.f32 %v3368_v31, %v1478_v11  ;;  %v2450_v11 = vld [vmem:[%s4243_s1 + $0x19] ss:$0 sm:$0xff]  ;;  %v3276_v31 = vpack.c.bf16 %v2460_v30, %v2459_v29  ;;  %v2481_v29 = vld [vmem:[%s4243_s1 + $0x1f] ss:$0 sm:$0xff] }
0x112f   : > { %v1492_v36 = vmul.f32 %v2422_v32, %v1486_v33 }
0x1131   : > { %v1498_v37 = vadd.f32 %v2423_v35, %v1492_v36 }
0x1133   : > { %2936 = vmatmul.mubr.msk.f32.vlgmr.msra.gmra.mrb[10].mxu1 %vm435_vm5, %v1498_v37 }
0x1134   : > { %2989 = vmatprep.mubr.msk.f32.mxu1 %vm3400_vm0, %v3401_v6  ;;  %3268 = vmatpush3.bf16.msra.mxu1 %v3267_v22 }
0x1135   : > { %3269 = vmatprep.subr.bf16.mxu1 %v3399_v3 }
0x1138   : > { %3271 = vmatpush3.bf16.msra.mxu1 %v3270_v25 }
0x1139   : > { %3272 = vmatprep.subr.bf16.mxu1 %v3399_v3 }
0x113c   : > { %3274 = vmatpush3.bf16.msra.mxu1 %v3273_v28 }
0x113d   : > { %3275 = vmatprep.subr.bf16.mxu1 %v3399_v3 }
0x1140   : > { %3277 = vmatpush3.bf16.msra.mxu1 %v3276_v31 }
0x1141   : > { %3278 = vmatprep.subr.bf16.mxu1 %v3399_v3 }
0x1206   : > { %v1582_v60 = vpop.f32.mrb[10].mxu1 }
0x1207   : > { %v1583_v61 = vadd.f32 %v2432_v59, %v1582_v60  ;;  %v2937_v62 = vpop.f32.mrb[11].mxu1  ;;  %v2468_v59 = vld [vmem:[%s4247_s5 + $0x198] sm:$0xff] }
0x1208   : > { %v3282_v60 = vpack.c.bf16 %v2468_v59, %v2467_v57  ;;  %v2470_v62 = vld [vmem:[%s4247_s5 + $0x1a8] sm:$0xff]  ;;  %v1966_v59 = vld [vmem:[%s4249_s7 + $0x30] sm:$0xff] }
0x1209   : > { %v1587_v63 = vmul.f32 0.044715, %v1583_v61  ;;  %v1586_v7 = vmul.f32 0.5, %v1583_v61  ;;  %v1965_v57 = vld [vmem:[%s4249_s7 + $0x28] sm:$0xff] }
0x120b   : > { %v1588_v0 = vmul.f32 %v1587_v63, %v1583_v61 }
0x120d   : > { %v1589_v1 = vmul.f32 %v1588_v0, %v1583_v61 }
0x120f   : > { %v1590_v2 = vadd.f32 %v1589_v1, %v1583_v61  ;;  %v2469_v61 = vld [vmem:[%s4247_s5 + $0x1a0] sm:$0xff] }
0x1210   : > { %v3285_v63 = vpack.c.bf16 %v2470_v62, %v2469_v61 }
0x1211   : > { %v1591_v4 = vmul.f32 0.7978846, %v1590_v2 }
0x1213   : > { %3369 = vtanh.f32 %v1591_v4 }
0x121d   : > { %v3370_v5 = vpop.eup %3369 }
0x121e   : > { %v1593_v8 = vadd.f32 1.0, %v3370_v5  ;;  %v2471_v5 = vld [vmem:[%s4247_s5 + $0x1b0] sm:$0xff] }
0x1220   : > { %v1594_v9 = vmul.f32 %v1593_v8, %v1586_v7  ;;  %v2472_v7 = vld [vmem:[%s4247_s5 + $0x1b8] sm:$0xff] }
0x1221   : > { %v3288_v8 = vpack.c.bf16 %v2472_v7, %v2471_v5  ;;  %v2483_v5 = vld [vmem:[%s4243_s1 + $0x21] ss:$0 sm:$0xff] }
0x1222   : > { %2971 = vmatmul.mubr.f32.vlgmr.msra.gmra.mrb[12].mxu0 %v1594_v9  ;;  %v2473_v9 = vld [vmem:[%s4247_s5 + $0x1c0] sm:$0xff] }
0x1223   : > { %3043 = vmatprep.mubr.msk.f32.mxu0 %vm3400_vm0, %v3401_v6 }
0x12f5   : > { %v1678_v10 = vpop.f32.mrb[12].mxu0 }
0x12f6   : > { %v1682_v34 = vadd.f32 %v1678_v10, %v1498_v37  ;;  %v2972_v12 = vpop.f32.mrb[13].mxu0  ;;  %v2451_v37 = vld [vmem:[%s4243_s1 + $0x1a] ss:$0 sm:$0xff]  ;;  %v2474_v10 = vld [vmem:[%s4247_s5 + $0x1c8] sm:$0xff] }
0x12f7   : > { %v2476_v12 = vld [vmem:[%s4247_s5 + $0x1d8] sm:$0xff] }
0x12f8   : > { %v1688_v13 = vadd.f32 %v2450_v11, %v1682_v34  ;;  %v3291_v11 = vpack.c.bf16 %v2474_v10, %v2473_v9  ;;  %v2475_v34 = vld [vmem:[%s4247_s5 + $0x1d0] sm:$0xff]  ;;  %v2069_v9 = vld [vmem:[%s4248_s6 + $0x8] sm:$0xff] }
0x12fa   : > { %v1689_v14 = vsel %vm435_vm5, %v1688_v13, 0.0 }
0x12fb   : > { %1690 = vadd.xlane.f32.xlu0 %v1689_v14  ;;  %v2477_v14 = vld [vmem:[%s4247_s5 + $0x1e0] sm:$0xff] }
0x1388   : > { %v1691_v15 = vpop.xlane.xlu0 %1690 }
0x1389   : > { %v1692_v16 = vmul.f32 0.015625, %v1691_v15  ;;  %v2478_v15 = vld [vmem:[%s4247_s5 + $0x1e8] sm:$0xff] }
0x138b   : > { %v1693_v17 = vsub.f32 %v1688_v13, %v1692_v16  ;;  %v3294_v13 = vpack.c.bf16 %v2476_v12, %v2475_v34  ;;  %v3297_v16 = vpack.c.bf16 %v2478_v15, %v2477_v14  ;;  %v2070_v12 = vld [vmem:[%s4248_s6 + $0x10] sm:$0xff]  ;;  %v2073_v15 = vld [vmem:[%s4248_s6 + $0x28] sm:$0xff] }
0x138d   : > { %v1694_v18 = vmul.f32 %v1693_v17, %v1693_v17 }
0x138f   : > { %v1695_v19 = vsel %vm435_vm5, %v1694_v18, 0.0  ;;  %v2480_v18 = vld [vmem:[%s4247_s5 + $0x1f8] sm:$0xff] }
0x1390   : > { %1696 = vadd.xlane.f32.xlu1 %v1695_v19 }
0x141d   : > { %v1697_v32 = vpop.xlane.xlu1 %1696 }
0x141e   : > { %v1698_v33 = vmul.f32 0.015625, %v1697_v32 }
0x1420   : > { %v1699_v35 = vadd.f32 1e-05, %v1698_v33 }
0x1422   : > { %3371 = vrsqrt.f32 %v1699_v35 }
0x142c   : > { %v3372_v36 = vpop.eup %3371 }
0x142d   : > { %v1701_v38 = vmul.f32 %v3372_v36, %v1693_v17  ;;  %v2479_v17 = vld [vmem:[%s4247_s5 + $0x1f0] sm:$0xff] }
0x142e   : > { %v3300_v19 = vpack.c.bf16 %v2480_v18, %v2479_v17  ;;  %v2074_v17 = vld [vmem:[%s4248_s6 + $0x30] sm:$0xff] }
0x142f   : > { %v1707_v40 = vmul.f32 %v2451_v37, %v1701_v38 }
0x1431   : > { %v4056_v41 = vadd.f32 %v2452_v39, %v1707_v40 }
0x1433   : > { %2990 = vmatmul.mubr.msk.f32.vlgmr.msra.gmra.mrb[12].mxu1 %vm435_vm5, %v4056_v41 }
0x1434   : > { %3024 = vmatprep.mubr.msk.f32.mxu1 %vm3400_vm0, %v3401_v6  ;;  %3280 = vmatpush3.bf16.msra.mxu1 %v3279_v58  ;;  %v3309_v58 = vpack.c.bf16 %v1965_v57, %v1964_v56 }
0x1435   : > { %3281 = vmatprep.subr.bf16.mxu1 %v3399_v3 }
0x1438   : > { %3283 = vmatpush3.bf16.msra.mxu1 %v3282_v60  ;;  %v1967_v60 = vld [vmem:[%s4249_s7 + $0x38] sm:$0xff] }
0x1439   : > { %3284 = vmatprep.subr.bf16.mxu1 %v3399_v3  ;;  %v3312_v61 = vpack.c.bf16 %v1967_v60, %v1966_v59 }
0x143c   : > { %3286 = vmatpush3.bf16.msra.mxu1 %v3285_v63 }
0x143d   : > { %3287 = vmatprep.subr.bf16.mxu1 %v3399_v3 }
0x1440   : > { %3289 = vmatpush3.bf16.msra.mxu1 %v3288_v8  ;;  %v2068_v8 = vld [vmem:[%s4248_s6] sm:$0xff] }
0x1441   : > { %3290 = vmatprep.subr.bf16.mxu1 %v3399_v3 }
0x1444   : > { %3292 = vmatpush3.bf16.msra.mxu1 %v3291_v11  ;;  %v3315_v11 = vpack.c.bf16 %v2069_v9, %v2068_v8  ;;  %v2490_v8 = vld [vmem:[%s4243_s1 + $0x26] ss:$0 sm:$0xff] }
0x1445   : > { %3293 = vmatprep.subr.bf16.mxu1 %v3399_v3 }
0x1448   : > { %3295 = vmatpush3.bf16.msra.mxu1 %v3294_v13  ;;  %v2071_v13 = vld [vmem:[%s4248_s6 + $0x18] sm:$0xff] }
0x1449   : > { %3296 = vmatprep.subr.bf16.mxu1 %v3399_v3  ;;  %v3318_v14 = vpack.c.bf16 %v2071_v13, %v2070_v12 }
0x144c   : > { %3298 = vmatpush3.bf16.msra.mxu1 %v3297_v16 }
0x144d   : > { %3299 = vmatprep.subr.bf16.mxu1 %v3399_v3 }
0x1450   : > { %3301 = vmatpush3.bf16.msra.mxu1 %v3300_v19 }
0x1451   : > { %3326 = vmatprep.subr.bf16.mxu1 %v3399_v3 }
0x1506   : > { %v1797_v43 = vpop.f32.mrb[12].mxu1 }
0x1507   : > { %v1798_v44 = vadd.f32 %v2461_v42, %v1797_v43  ;;  %v2991_v45 = vpop.f32.mrb[13].mxu1 }
0x1509   : > { %v1802_v46 = vmul.f32 0.044715, %v1798_v44  ;;  %v1801_v52 = vmul.f32 0.5, %v1798_v44 }
0x150b   : > { %v1803_v47 = vmul.f32 %v1802_v46, %v1798_v44 }
0x150d   : > { %v1804_v48 = vmul.f32 %v1803_v47, %v1798_v44 }
0x150f   : > { %v1805_v49 = vadd.f32 %v1804_v48, %v1798_v44 }
0x1511   : > { %v1806_v50 = vmul.f32 0.7978846, %v1805_v49 }
0x1513   : > { %3373 = vtanh.f32 %v1806_v50  ;;  %v1960_v50 = vld [vmem:[%s4249_s7] sm:$0xff] }
0x151d   : > { %v3374_v51 = vpop.eup %3373 }
0x151e   : > { %v1808_v53 = vadd.f32 1.0, %v3374_v51  ;;  %v1961_v51 = vld [vmem:[%s4249_s7 + $0x8] sm:$0xff] }
0x1520   : > { %v1809_v54 = vmul.f32 %v1808_v53, %v1801_v52  ;;  %v3303_v52 = vpack.c.bf16 %v1961_v51, %v1960_v50  ;;  %v1962_v53 = vld [vmem:[%s4249_s7 + $0x10] sm:$0xff]  ;;  %v2187_v50 = vld [vmem:[%s4250_s8] sm:$0xff]  ;;  %v2188_v51 = vld [vmem:[%s4250_s8 + $0x8] sm:$0xff] }
0x1522   : > { %1810 = vadd.xlane.f32.xlu0 %v1809_v54  ;;  %3304 = vmatpush3.bf16.msra.mxu0 %v3303_v52  ;;  %v3327_v52 = vpack.c.bf16 %v2188_v51, %v2187_v50 }
0x1523   : > { %3305 = vmatprep.subr.bf16.mxu0 %v3399_v3 }
0x15af   : > { %v1811_v0 = vpop.xlane.xlu0 %1810 }
0x15b0   : > { %v1812_v1 = vmul.f32 0.0078125, %v1811_v0 }
0x15b2   : > { %v1813_v2 = vsub.f32 %v1809_v54, %v1812_v1  ;;  %v1963_v54 = vld [vmem:[%s4249_s7 + $0x18] sm:$0xff] }
0x15b3   : > { %v3306_v55 = vpack.c.bf16 %v1963_v54, %v1962_v53  ;;  %v2189_v53 = vld [vmem:[%s4250_s8 + $0x10] sm:$0xff]  ;;  %v2190_v54 = vld [vmem:[%s4250_s8 + $0x18] sm:$0xff] }
0x15b4   : > { %v1814_v4 = vmul.f32 %v1813_v2, %v1813_v2 }
0x15b5   : > { %3307 = vmatpush3.bf16.msra.mxu0 %v3306_v55  ;;  %v3330_v55 = vpack.c.bf16 %v2190_v54, %v2189_v53 }
0x15b6   : > { %1815 = vadd.xlane.f32.xlu1 %v1814_v4  ;;  %3308 = vmatprep.subr.bf16.mxu0 %v3399_v3 }
0x15b9   : > { %3310 = vmatpush3.bf16.msra.mxu0 %v3309_v58 }
0x15ba   : > { %3311 = vmatprep.subr.bf16.mxu0 %v3399_v3 }
0x15bd   : > { %3313 = vmatpush3.bf16.msra.mxu0 %v3312_v61 }
0x15be   : > { %3314 = vmatprep.subr.bf16.mxu0 %v3399_v3 }
0x1643   : > { %v1816_v20 = vpop.xlane.xlu1 %1815 }
0x1644   : > { %v1817_v21 = vmul.f32 0.0078125, %v1816_v20 }
0x1646   : > { %v1818_v22 = vadd.f32 1e-05, %v1817_v21  ;;  %v2486_v21 = vld [vmem:[%s4243_s1 + $0x23] ss:$0 sm:$0xff] }
0x1648   : > { %3375 = vrsqrt.f32 %v1818_v22 }
0x1652   : > { %v3376_v23 = vpop.eup %3375 }
0x1653   : > { %v1820_v25 = vmul.f32 %v3376_v23, %v1813_v2  ;;  %v2482_v2 = vld [vmem:[%s4243_s1 + $0x20] ss:$0 sm:$0xff] }
0x1655   : > { %v1826_v27 = vmul.f32 %v2463_v24, %v1820_v25 }
0x1657   : > { %v1832_v28 = vadd.f32 %v2464_v26, %v1826_v27 }
0x1659   : > { %3025 = vmatmul.mubr.f32.vlgmr.msra.gmra.mrb[14].mxu1 %v1832_v28 }
0x165a   : > { %3073 = vmatprep.mubr.msk.f32.mxu1 %vm3400_vm0, %v3401_v6  ;;  %3328 = vmatpush3.bf16.msra.mxu1 %v3327_v52 }
0x165b   : > { %3329 = vmatprep.subr.bf16.mxu1 %v3399_v3 }
0x165e   : > { %3331 = vmatpush3.bf16.msra.mxu1 %v3330_v55 }
0x172c   : > { %v1921_v30 = vpop.f32.mrb[14].mxu1 }
0x172d   : > { %v1922_v31 = vadd.f32 %v2481_v29, %v1921_v30  ;;  %v3026_v32 = vpop.f32.mrb[15].mxu1 }
0x172f   : > { %v1926_v33 = vmul.f32 0.044715, %v1922_v31  ;;  %v1925_v40 = vmul.f32 0.5, %v1922_v31 }
0x1731   : > { %v1927_v35 = vmul.f32 %v1926_v33, %v1922_v31  ;;  %v2484_v33 = vld [vmem:[%s4243_s1 + $0x22] ss:$0 sm:$0xff] }
0x1733   : > { %v1928_v36 = vmul.f32 %v1927_v35, %v1922_v31 }
0x1735   : > { %v1929_v37 = vadd.f32 %v1928_v36, %v1922_v31 }
0x1737   : > { %v1930_v38 = vmul.f32 0.7978846, %v1929_v37 }
0x1739   : > { %3377 = vtanh.f32 %v1930_v38 }
0x1743   : > { %v3378_v39 = vpop.eup %3377 }
0x1744   : > { %v1932_v42 = vadd.f32 1.0, %v3378_v39 }
0x1746   : > { %v1933_v43 = vmul.f32 %v1932_v42, %v1925_v40 }
0x1748   : > { %v1934_v44 = vsel %vm435_vm5, %v1933_v43, 0.0 }
0x1749   : > { %1935 = vadd.xlane.f32.xlu0 %v1934_v44 }
0x17d6   : > { %v1936_v45 = vpop.xlane.xlu0 %1935 }
0x17d7   : > { %v1937_v46 = vmul.f32 0.015625, %v1936_v45 }
0x17d9   : > { %v1938_v47 = vsub.f32 %v1933_v43, %v1937_v46 }
0x17db   : > { %v1939_v48 = vmul.f32 %v1938_v47, %v1938_v47 }
0x17dd   : > { %v1940_v49 = vsel %vm435_vm5, %v1939_v48, 0.0 }
0x17de   : > { %1941 = vadd.xlane.f32.xlu1 %v1940_v49 }
0x186b   : > { %v1942_v62 = vpop.xlane.xlu1 %1941 }
0x186c   : > { %v1943_v63 = vmul.f32 0.015625, %v1942_v62 }
0x186e   : > { %v1944_v0 = vadd.f32 1e-05, %v1943_v63  ;;  %v2489_v63 = vld [vmem:[%s4243_s1 + $0x25] ss:$0 sm:$0xff] }
0x1870   : > { %3379 = vrsqrt.f32 %v1944_v0 }
0x187a   : > { %v3380_v1 = vpop.eup %3379 }
0x187b   : > { %v1946_v4 = vmul.f32 %v3380_v1, %v1938_v47 }
0x187d   : > { %v1952_v7 = vmul.f32 %v2482_v2, %v1946_v4 }
0x187f   : > { %v1958_v10 = vadd.f32 %v2483_v5, %v1952_v7 }
0x1881   : > { %v1959_v34 = vadd.f32 %v1958_v10, %v4056_v41  ;;  %v2072_v41 = vld [vmem:[%s4248_s6 + $0x20] sm:$0xff] }
0x1882   : > { %v3321_v16 = vpack.c.bf16 %v2073_v15, %v2072_v41 }
0x1883   : > { %3044 = vmatmul.mubr.msk.f32.vlgmr.msra.gmra.mrb[14].mxu0 %vm435_vm5, %v1959_v34 }
0x1884   : > { %3316 = vmatpush3.bf16.msra.mxu0 %v3315_v11  ;;  %3062 = vmatprep.mubr.msk.f32.mxu0 %vm3400_vm0, %v3401_v6  ;;  %v2075_v6 = vld [vmem:[%s4248_s6 + $0x38] sm:$0xff] }
0x1885   : > { %3317 = vmatprep.subr.bf16.mxu0 %v3399_v3  ;;  %v3324_v18 = vpack.c.bf16 %v2075_v6, %v2074_v17 }
0x1888   : > { %3319 = vmatpush3.bf16.msra.mxu0 %v3318_v14 }
0x1889   : > { %3320 = vmatprep.subr.bf16.mxu0 %v3399_v3 }
0x188c   : > { %3322 = vmatpush3.bf16.msra.mxu0 %v3321_v16 }
0x188d   : > { %3323 = vmatprep.subr.bf16.mxu0 %v3399_v3  ;;  %v2488_v3 = vld [vmem:[%s4243_s1 + $0x24] ss:$0 sm:$0xff] }
0x1890   : > { %3325 = vmatpush3.bf16.msra.mxu0 %v3324_v18 }
0x1893   : > { %3063 = vmatmul.mubr.msk.f32.vlgmr.msra.gmra.mrb[16].mxu0 %vm435_vm5, %v1959_v34 }
0x1956   : > { %v2042_v19 = vpop.f32.mrb[14].mxu0 }
0x1957   : > { %v3045_v20 = vpop.f32.mrb[15].mxu0  ;;  %v2043_v36 = vadd.f32 %v2484_v33, %v2042_v19 }
0x1959   : > { %v2047_v38 = vsel %vm2046_vm7, %v2043_v36, -inf }
0x1966   : > { %v2147_v22 = vpop.f32.mrb[16].mxu0 }
0x1967   : > { %v2148_v23 = vadd.f32 %v2486_v21, %v2147_v22  ;;  %v3064_v24 = vpop.f32.mrb[17].mxu0 }
0x1969   : > { %v2152_v25 = vmul.f32 0.044715, %v2148_v23  ;;  %v2151_v31 = vmul.f32 0.5, %v2148_v23 }
0x196b   : > { %v2153_v26 = vmul.f32 %v2152_v25, %v2148_v23 }
0x196d   : > { %v2154_v27 = vmul.f32 %v2153_v26, %v2148_v23 }
0x196f   : > { %v2155_v28 = vadd.f32 %v2154_v27, %v2148_v23 }
0x1971   : > { %v2156_v29 = vmul.f32 0.7978846, %v2155_v28 }
0x1973   : > { %3381 = vtanh.f32 %v2156_v29 }
0x197d   : > { %v3382_v30 = vpop.eup %3381 }
0x197e   : > { %v2158_v32 = vadd.f32 1.0, %v3382_v30 }
0x1980   : > { %v2159_v35 = vmul.f32 %v2158_v32, %v2151_v31 }
0x1982   : > { %v2161_v37 = vsel %vm2160_vm6, %v2159_v35, 0.0 }
0x1983   : > { %2162 = vadd.xlane.f32.xlu0 %v2161_v37 }
0x1987   : > { %2048 = vmax.xlane.f32.xlu0 %v2047_v38 }
0x1a10   : > { %v2163_v39 = vpop.xlane.xlu0 %2162 }
0x1a11   : > { %v2165_v40 = vmul.f32 0.03125, %v2163_v39 }
0x1a13   : > { %v2166_v42 = vsub.f32 %v2159_v35, %v2165_v40 }
0x1a14   : > { %v2049_v43 = vpop.xlane.xlu0 %2048 }
0x1a15   : > { %v2050_v44 = vsub.f32 %v2043_v36, %v2049_v43  ;;  %v2167_v45 = vmul.f32 %v2166_v42, %v2166_v42 }
0x1a17   : > { %v2051_v46 = vmul.f32 1.442695, %v2050_v44  ;;  %v2168_v47 = vsel %vm2160_vm6, %v2167_v45, 0.0 }
0x1a18   : > { %2169 = vadd.xlane.f32.xlu1 %v2168_v47 }
0x1a19   : > { %3383 = vpow2.f32 %v2051_v46 }
0x1a23   : > { %v3384_v48 = vpop.eup %3383 }
0x1a24   : > { %v2054_v49 = vsel %vm2053_vm8, %v3384_v48, 0.0 }
0x1a25   : > { %2055 = vadd.xlane.f32.xlu0 %v2054_v49 }
0x1a29   : > { %2060 = vrot.lane.b32.xlu1 %v3384_v48, %s3403_s25 }
0x1aa5   : > { %v2170_v56 = vpop.xlane.xlu1 %2169 }
0x1aa6   : > { %v2171_v57 = vmul.f32 0.03125, %v2170_v56 }
0x1aa8   : > { %v2172_v58 = vadd.f32 1e-05, %v2171_v57 }
0x1aa9   : > { %v2061_v59 = vpop.permute.xlu1 %2060 }
0x1aaa   : > { %3385 = vrsqrt.f32 %v2172_v58  ;;  %v2063_v60 = vsel %vm2053_vm8, %v2061_v59, 0.0 }
0x1aab   : > { %2064 = vadd.xlane.f32.xlu0 %v2063_v60 }
0x1ab2   : > { %v2056_v2 = vpop.xlane.xlu0 %2055 }
0x1ab3   : > { %3387 = vrcp.f32 %v2056_v2 }
0x1ab4   : > { %v3386_v61 = vpop.eup %3385 }
0x1ab5   : > { %v2174_v62 = vmul.f32 %v3386_v61, %v2166_v42 }
0x1ab7   : > { %v2180_v0 = vmul.f32 %v2488_v3, %v2174_v62 }
0x1ab9   : > { %v2186_v1 = vadd.f32 %v2489_v63, %v2180_v0 }
0x1abb   : > { %3074 = vmatmul.mubr.msk.f32.vlgmr.msra.gmra.mrb[16].mxu1 %vm2160_vm6, %v2186_v1 }
0x1abd   : > { %v3388_v5 = vpop.eup %3387 }
0x1abe   : > { %v2058_v10 = vmul.f32 %v3388_v5, %v3384_v48 }
0x1b38   : > { %v2065_v4 = vpop.xlane.xlu0 %2064 }
0x1b39   : > { %3389 = vrcp.f32 %v2065_v4 }
0x1b43   : > { %v3390_v7 = vpop.eup %3389 }
0x1b44   : > { %v2067_v11 = vmul.f32 %v3390_v7, %v3384_v48 }
0x1b8e   : > { %v2265_v9 = vpop.f32.mrb[16].mxu1 }
0x1b8f   : > { %v2266_v34 = vadd.f32 %v2490_v8, %v2265_v9  ;;  %v3075_v12 = vpop.f32.mrb[17].mxu1 }
0x1b91   : > { %v2269_v13 = vmul.f32 %v2266_v34, %v2058_v10  ;;  %v2271_v14 = vmul.f32 %v2266_v34, %v2067_v11 }
0x1b93   : > { %2270 = vst.msk [vmem:[%s327_s24] sm:$0xff] %vm2053_vm8, %v2269_v13 }
0x1b94   : > { %2273 = vst.msk [vmem:[%s327_s24] sm:$0xff] %vm2272_vm9, %v2271_v14 }
0x1b95 PF: > { %s19_s30 = sadd.s32 1, %s3397_s30  }
0x1b96   : > { %p16_p4 = scmp.ge.s32.totalorder %s19_s30, 6  }
0x1b98   :  { %18 = sbr.rel (!%p16_p4) target bundleno = 1 (0x1), region = 96 }

</bundles_post_ra>
